<compile_context>
chip_gen: v7x
topology: tpu7x:2x2x1
jax: 0.10.0
libtpu: 0.0.40
codegen_flags: <defaults>
</compile_context>

<pallas_src>
import math

import jax
import jax.numpy as jnp
from jax.experimental import pallas as pl
from jax.experimental.pallas import tpu as pltpu

# ---------------- small synthetic BERT config ----------------
VOCAB = 100
HIDDEN = 64
NUM_HEADS = 2
HEAD_DIM = HIDDEN // NUM_HEADS
NUM_LAYERS = 2
INTERMEDIATE = 128
MAX_POS = 16
TYPE_VOCAB = 2
NUM_CLASSES = 3
CLS_PAD = 128                     # pad classifier output to a full 128-lane vreg
PADH = 128                        # per-head lane-padded slot width
QKV_W = 3 * NUM_HEADS * PADH      # fused, lane-padded QKV output width (= 768)
N_LVEC = 8                        # packed per-layer vector rows
LN_EPS = 1e-12


# ---------------- in-kernel helpers ----------------
def _layernorm(x, g, b):
    mean = jnp.mean(x, axis=-1, keepdims=True)
    xc = x - mean
    var = jnp.mean(xc * xc, axis=-1, keepdims=True)
    return xc * jax.lax.rsqrt(var + LN_EPS) * g + b


def _mm(x, w_bf16):
    # Activation cast only; weights were pre-cast to bf16 in prepare_weights().
    return jnp.dot(x.astype(jnp.bfloat16), w_bf16,
                   preferred_element_type=jnp.float32)


# ---------------- the fused forward kernel (single invocation) ----------------
def _make_bert_kernel(batch, seq):
    def kernel(emb_ref, mask_ref,
               qkv_w_ref, ao_w_ref, ff_w1_ref, ff_w2_ref,
               pool_w_ref, cls_w_ref, lvec_ref, gvec_ref,
               out_ref):
        gv = gvec_ref[...]                               # (4, 128) f32
        emb_g = gv[0:1, 0:HIDDEN]
        emb_b = gv[1:2, 0:HIDDEN]
        pool_b = gv[2:3, 0:HIDDEN]
        cls_b = gv[3:4, :]

        h = _layernorm(emb_ref[...], emb_g, emb_b)       # (B*S, H) f32
        mask = mask_ref[...]                             # (B*S, B*S) additive

        for l in range(NUM_LAYERS):
            vec = lvec_ref[l]                            # (8, QKV_W) f32
            qkv_b = vec[0:1, :]
            ao_b = vec[1:2, 0:HIDDEN]
            ao_g = vec[2:3, 0:HIDDEN]
            ao_bb = vec[3:4, 0:HIDDEN]
            ff_b1 = vec[4:5, 0:INTERMEDIATE]
            ff_b2 = vec[5:6, 0:HIDDEN]
            ff_g = vec[6:7, 0:HIDDEN]
            ff_bb = vec[7:8, 0:HIDDEN]

            # ---- self-attention: fused QKV projection for the whole batch ----
            qkv = _mm(h, qkv_w_ref[l]) + qkv_b           # (B*S, 768)
            ao_w_l = ao_w_ref[l]                         # (NH, 128, H) bf16

            attn = None
            for hd in range(NUM_HEADS):
                qo = hd * PADH
                ko = (NUM_HEADS + hd) * PADH
                vo = (2 * NUM_HEADS + hd) * PADH
                q = qkv[:, qo:qo + PADH]                 # lane-aligned 128-wide
                k = qkv[:, ko:ko + PADH]
                v = qkv[:, vo:vo + PADH]
                # q @ k^T without an explicit transpose; zero-padded lanes add 0.
                # The 1/sqrt(HEAD_DIM) scale is folded into the Q weights/bias.
                s = jax.lax.dot_general(
                    q.astype(jnp.bfloat16), k.astype(jnp.bfloat16),
                    (((1,), (1,)), ((), ())),
                    preferred_element_type=jnp.float32)  # (B*S, B*S)
                s = s + mask
                s = s - jnp.max(s, axis=-1, keepdims=True)
                p = jnp.exp(s)
                p = p * pl.reciprocal(jnp.sum(p, axis=-1, keepdims=True),
                                      approx=True)
                ctx = _mm(p, v.astype(jnp.bfloat16))     # (B*S, 128), pad cols 0
                contrib = _mm(ctx, ao_w_l[hd])           # (B*S, H)
                attn = contrib if attn is None else attn + contrib

            h = _layernorm(attn + ao_b + h, ao_g, ao_bb)

            # ---- feed-forward ----
            inter = _mm(h, ff_w1_ref[l]) + ff_b1
            # TODO(synk): HF BERT uses exact erf-GELU; tanh approximation here.
            inter = jax.nn.gelu(inter, approximate=True)
            ff = _mm(inter, ff_w2_ref[l]) + ff_b2
            h = _layernorm(ff + h, ff_g, ff_bb)

        # ---- pooler + classifier on each example's CLS token ----
        cls_tok = jnp.concatenate(
            [h[b * seq:b * seq + 1, :] for b in range(batch)], axis=0)  # (B, H)
        pooled = jnp.tanh(_mm(cls_tok, pool_w_ref[...]) + pool_b)
        out_ref[...] = _mm(pooled, cls_w_ref[...]) + cls_b   # (B, 128) lane-dense

    return kernel


# ---------------- parameter init (deterministic, synthetic) ----------------
def init_params(key):
    keys = iter(jax.random.split(key, 256))

    def nrm(shape, scale=0.02):
        return scale * jax.random.normal(next(keys), shape, jnp.float32)

    params = {
        "word_emb": nrm((VOCAB, HIDDEN)),
        "pos_emb": nrm((MAX_POS, HIDDEN)),
        "type_emb": nrm((TYPE_VOCAB, HIDDEN)),
        "emb_ln_g": jnp.ones((HIDDEN,), jnp.float32),
        "emb_ln_b": jnp.zeros((HIDDEN,), jnp.float32),
        "pool_w": nrm((HIDDEN, HIDDEN)),
        "pool_b": jnp.zeros((HIDDEN,), jnp.float32),
        "cls_w": nrm((HIDDEN, NUM_CLASSES)),
        "cls_b": jnp.zeros((NUM_CLASSES,), jnp.float32),
        "layers": [],
    }
    for _ in range(NUM_LAYERS):
        params["layers"].append({
            "q_w": nrm((HIDDEN, HIDDEN)), "q_b": jnp.zeros((HIDDEN,), jnp.float32),
            "k_w": nrm((HIDDEN, HIDDEN)), "k_b": jnp.zeros((HIDDEN,), jnp.float32),
            "v_w": nrm((HIDDEN, HIDDEN)), "v_b": jnp.zeros((HIDDEN,), jnp.float32),
            "ao_w": nrm((HIDDEN, HIDDEN)), "ao_b": jnp.zeros((HIDDEN,), jnp.float32),
            "ao_ln_g": jnp.ones((HIDDEN,), jnp.float32),
            "ao_ln_b": jnp.zeros((HIDDEN,), jnp.float32),
            "ff_w1": nrm((HIDDEN, INTERMEDIATE)),
            "ff_b1": jnp.zeros((INTERMEDIATE,), jnp.float32),
            "ff_w2": nrm((INTERMEDIATE, HIDDEN)),
            "ff_b2": jnp.zeros((HIDDEN,), jnp.float32),
            "ff_ln_g": jnp.ones((HIDDEN,), jnp.float32),
            "ff_ln_b": jnp.zeros((HIDDEN,), jnp.float32),
        })
    return params


# ---------------- one-time weight preparation (outside the per-call jit) ----
def prepare_weights(params):
    L = NUM_LAYERS
    scale = 1.0 / math.sqrt(HEAD_DIM)

    qkv_w = jnp.zeros((L, HIDDEN, QKV_W), jnp.float32)
    qkv_b = jnp.zeros((L, QKV_W), jnp.float32)
    ao_w = jnp.zeros((L, NUM_HEADS, PADH, HIDDEN), jnp.float32)

    for l, lyr in enumerate(params["layers"]):
        for hd in range(NUM_HEADS):
            lo, hi = hd * HEAD_DIM, (hd + 1) * HEAD_DIM
            qo = hd * PADH
            ko = (NUM_HEADS + hd) * PADH
            vo = (2 * NUM_HEADS + hd) * PADH
            # Q slot, with the attention scale folded in.
            qkv_w = qkv_w.at[l, :, qo:qo + HEAD_DIM].set(lyr["q_w"][:, lo:hi] * scale)
            qkv_b = qkv_b.at[l, qo:qo + HEAD_DIM].set(lyr["q_b"][lo:hi] * scale)
            # K / V slots.
            qkv_w = qkv_w.at[l, :, ko:ko + HEAD_DIM].set(lyr["k_w"][:, lo:hi])
            qkv_b = qkv_b.at[l, ko:ko + HEAD_DIM].set(lyr["k_b"][lo:hi])
            qkv_w = qkv_w.at[l, :, vo:vo + HEAD_DIM].set(lyr["v_w"][:, lo:hi])
            qkv_b = qkv_b.at[l, vo:vo + HEAD_DIM].set(lyr["v_b"][lo:hi])
            # Attention-output weight, per-head row block padded to 128 rows.
            ao_w = ao_w.at[l, hd, 0:HEAD_DIM, :].set(lyr["ao_w"][lo:hi, :])

    # Pack the tiny per-layer vectors into one resident array (L, 8, 768).
    lvec = jnp.zeros((L, N_LVEC, QKV_W), jnp.float32)
    for l, lyr in enumerate(params["layers"]):
        lvec = lvec.at[l, 0, :].set(qkv_b[l])
        lvec = lvec.at[l, 1, 0:HIDDEN].set(lyr["ao_b"])
        lvec = lvec.at[l, 2, 0:HIDDEN].set(lyr["ao_ln_g"])
        lvec = lvec.at[l, 3, 0:HIDDEN].set(lyr["ao_ln_b"])
        lvec = lvec.at[l, 4, 0:INTERMEDIATE].set(lyr["ff_b1"])
        lvec = lvec.at[l, 5, 0:HIDDEN].set(lyr["ff_b2"])
        lvec = lvec.at[l, 6, 0:HIDDEN].set(lyr["ff_ln_g"])
        lvec = lvec.at[l, 7, 0:HIDDEN].set(lyr["ff_ln_b"])

    # Global (non-layer) vectors: emb LN gamma/beta, pooler bias, classifier bias.
    gvec = jnp.zeros((4, CLS_PAD), jnp.float32)
    gvec = gvec.at[0, 0:HIDDEN].set(params["emb_ln_g"])
    gvec = gvec.at[1, 0:HIDDEN].set(params["emb_ln_b"])
    gvec = gvec.at[2, 0:HIDDEN].set(params["pool_b"])
    gvec = gvec.at[3, 0:NUM_CLASSES].set(params["cls_b"])

    ff_w1 = jnp.stack([lyr["ff_w1"] for lyr in params["layers"]], axis=0)
    ff_w2 = jnp.stack([lyr["ff_w2"] for lyr in params["layers"]], axis=0)
    cls_w = jnp.zeros((HIDDEN, CLS_PAD), jnp.float32).at[:, 0:NUM_CLASSES].set(
        params["cls_w"])

    # Matmul weights pre-cast to bf16 once (halves weight DMA bytes + VMEM,
    # removes per-call in-kernel pack ops); LN params / biases stay f32.
    return {
        "word_emb": params["word_emb"],
        "pos_emb": params["pos_emb"],
        "type_emb": params["type_emb"],
        "qkv_w": qkv_w.astype(jnp.bfloat16),
        "ao_w": ao_w.astype(jnp.bfloat16),
        "ff_w1": ff_w1.astype(jnp.bfloat16),
        "ff_w2": ff_w2.astype(jnp.bfloat16),
        "pool_w": params["pool_w"].astype(jnp.bfloat16),
        "cls_w": cls_w.astype(jnp.bfloat16),
        "lvec": lvec,
        "gvec": gvec,
    }


# ---------------- forward pass ----------------
def bert_text_classifier(prepared, input_ids, attention_mask):
    B, S = input_ids.shape
    BS = B * S

    # Embedding gathers stay in plain JAX (glue); token_type_ids are zeros.
    pos_ids = jnp.arange(S)
    emb = (prepared["word_emb"][input_ids]
           + prepared["pos_emb"][pos_ids][None, :, :]
           + prepared["type_emb"][0][None, None, :])
    emb = emb.reshape(BS, HIDDEN).astype(jnp.float32)

    # Block-diagonal additive mask: BERT's (1-mask)*-10000 padding mask fused
    # with the batch-fold (cross-example key positions also get -10000).
    key_valid = attention_mask.astype(jnp.float32).reshape(BS)
    ex_id = jnp.repeat(jnp.arange(B, dtype=jnp.int32), S)
    same_ex = (ex_id[:, None] == ex_id[None, :]).astype(jnp.float32)
    mask = (1.0 - same_ex * key_valid[None, :]) * -10000.0        # (BS, BS)

    vmem = pl.BlockSpec(memory_space=pltpu.MemorySpace.VMEM)
    logits_pad = pl.pallas_call(
        _make_bert_kernel(B, S),
        out_shape=jax.ShapeDtypeStruct((B, CLS_PAD), jnp.float32),
        in_specs=[vmem] * 10,
        out_specs=vmem,
    )(emb, mask,
      prepared["qkv_w"], prepared["ao_w"], prepared["ff_w1"], prepared["ff_w2"],
      prepared["pool_w"], prepared["cls_w"], prepared["lvec"], prepared["gvec"])

    return logits_pad[:, :NUM_CLASSES]


if __name__ == "__main__":
    key = jax.random.PRNGKey(0)
    pkey, ikey = jax.random.split(key, 2)
    params = init_params(pkey)
    prepared = prepare_weights(params)      # one-time prep, outside the jit

    B, S = 2, 8
    input_ids = jax.random.randint(ikey, (B, S), 0, VOCAB, dtype=jnp.int32)
    attention_mask = jnp.concatenate(
        [jnp.ones((B, 6), jnp.int32), jnp.zeros((B, 2), jnp.int32)], axis=1)

    fwd = jax.jit(bert_text_classifier)
    logits = fwd(prepared, input_ids, attention_mask)
    jax.block_until_ready(logits)
    assert logits.shape == (B, NUM_CLASSES)
    assert bool(jnp.all(jnp.isfinite(logits)))
    print("KERNEL_OK")
</pallas_src>

<mosaic_0001>
module attributes {stable_mosaic.version = 11 : i64} {
  func.func @kernel(%arg0: memref<16x64xf32, #tpu.memory_space<vmem>>, %arg1: memref<16x16xf32, #tpu.memory_space<vmem>>, %arg2: memref<2x64x768xbf16, #tpu.memory_space<vmem>>, %arg3: memref<2x2x128x64xbf16, #tpu.memory_space<vmem>>, %arg4: memref<2x64x128xbf16, #tpu.memory_space<vmem>>, %arg5: memref<2x128x64xbf16, #tpu.memory_space<vmem>>, %arg6: memref<64x64xbf16, #tpu.memory_space<vmem>>, %arg7: memref<64x128xbf16, #tpu.memory_space<vmem>>, %arg8: memref<2x8x768xf32, #tpu.memory_space<vmem>>, %arg9: memref<4x128xf32, #tpu.memory_space<vmem>>, %arg10: memref<2x128xf32, #tpu.memory_space<vmem>>) attributes {dimension_semantics = [], scalar_prefetch = 0 : i64, scratch_operands = 0 : i64, tpu.core_type = #tpu.core_type<tc>} {
    %c0 = arith.constant 0 : index
    %c0_0 = arith.constant 0 : index
    %0 = vector.load %arg9[%c0, %c0_0] : memref<4x128xf32, #tpu.memory_space<vmem>>, vector<4x128xf32>
    %1 = vector.extract_strided_slice %0 {offsets = [0, 0], sizes = [1, 64], strides = [1, 1]} : vector<4x128xf32> to vector<1x64xf32>
    %2 = vector.extract_strided_slice %0 {offsets = [1, 0], sizes = [1, 64], strides = [1, 1]} : vector<4x128xf32> to vector<1x64xf32>
    %3 = vector.extract_strided_slice %0 {offsets = [2, 0], sizes = [1, 64], strides = [1, 1]} : vector<4x128xf32> to vector<1x64xf32>
    %4 = vector.extract_strided_slice %0 {offsets = [3, 0], sizes = [1, 128], strides = [1, 1]} : vector<4x128xf32> to vector<1x128xf32>
    %c0_1 = arith.constant 0 : index
    %c0_2 = arith.constant 0 : index
    %5 = vector.load %arg0[%c0_1, %c0_2] : memref<16x64xf32, #tpu.memory_space<vmem>>, vector<16x64xf32>
    %cst = arith.constant dense<0.000000e+00> : vector<16xf32>
    %6 = vector.multi_reduction <add>, %5, %cst [1] : vector<16x64xf32> to vector<16xf32>
    %7 = vector.shape_cast %6 : vector<16xf32> to vector<16x1xf32>
    %cst_3 = arith.constant 6.400000e+01 : f32
    %8 = vector.broadcast %cst_3 : f32 to vector<16x1xf32>
    %9 = arith.divf %7, %8 : vector<16x1xf32>
    %10 = vector.broadcast %9 : vector<16x1xf32> to vector<16x64xf32>
    %11 = arith.subf %5, %10 : vector<16x64xf32>
    %12 = arith.mulf %11, %11 : vector<16x64xf32>
    %cst_4 = arith.constant dense<0.000000e+00> : vector<16xf32>
    %13 = vector.multi_reduction <add>, %12, %cst_4 [1] : vector<16x64xf32> to vector<16xf32>
    %14 = vector.shape_cast %13 : vector<16xf32> to vector<16x1xf32>
    %cst_5 = arith.constant 6.400000e+01 : f32
    %15 = vector.broadcast %cst_5 : f32 to vector<16x1xf32>
    %16 = arith.divf %14, %15 : vector<16x1xf32>
    %cst_6 = arith.constant 9.99999996E-13 : f32
    %17 = vector.broadcast %cst_6 : f32 to vector<16x1xf32>
    %18 = arith.addf %16, %17 : vector<16x1xf32>
    %19 = math.rsqrt %18 : vector<16x1xf32>
    %20 = vector.broadcast %19 : vector<16x1xf32> to vector<16x64xf32>
    %21 = arith.mulf %11, %20 : vector<16x64xf32>
    %22 = vector.broadcast %1 : vector<1x64xf32> to vector<16x64xf32>
    %23 = arith.mulf %21, %22 : vector<16x64xf32>
    %24 = vector.broadcast %2 : vector<1x64xf32> to vector<16x64xf32>
    %25 = arith.addf %23, %24 : vector<16x64xf32>
    %c0_7 = arith.constant 0 : index
    %c0_8 = arith.constant 0 : index
    %26 = vector.load %arg1[%c0_7, %c0_8] : memref<16x16xf32, #tpu.memory_space<vmem>>, vector<16x16xf32>
    %c0_9 = arith.constant 0 : index
    %c0_10 = arith.constant 0 : index
    %c0_11 = arith.constant 0 : index
    %27 = vector.load %arg8[%c0_9, %c0_10, %c0_11] : memref<2x8x768xf32, #tpu.memory_space<vmem>>, vector<1x8x768xf32>
    %28 = vector.shape_cast %27 : vector<1x8x768xf32> to vector<8x768xf32>
    %29 = vector.extract_strided_slice %28 {offsets = [0, 0], sizes = [1, 768], strides = [1, 1]} : vector<8x768xf32> to vector<1x768xf32>
    %30 = vector.extract_strided_slice %28 {offsets = [1, 0], sizes = [1, 64], strides = [1, 1]} : vector<8x768xf32> to vector<1x64xf32>
    %31 = vector.extract_strided_slice %28 {offsets = [2, 0], sizes = [1, 64], strides = [1, 1]} : vector<8x768xf32> to vector<1x64xf32>
    %32 = vector.extract_strided_slice %28 {offsets = [3, 0], sizes = [1, 64], strides = [1, 1]} : vector<8x768xf32> to vector<1x64xf32>
    %33 = vector.extract_strided_slice %28 {offsets = [4, 0], sizes = [1, 128], strides = [1, 1]} : vector<8x768xf32> to vector<1x128xf32>
    %34 = vector.extract_strided_slice %28 {offsets = [5, 0], sizes = [1, 64], strides = [1, 1]} : vector<8x768xf32> to vector<1x64xf32>
    %35 = vector.extract_strided_slice %28 {offsets = [6, 0], sizes = [1, 64], strides = [1, 1]} : vector<8x768xf32> to vector<1x64xf32>
    %36 = vector.extract_strided_slice %28 {offsets = [7, 0], sizes = [1, 64], strides = [1, 1]} : vector<8x768xf32> to vector<1x64xf32>
    %c0_12 = arith.constant 0 : index
    %c0_13 = arith.constant 0 : index
    %c0_14 = arith.constant 0 : index
    %37 = vector.load %arg2[%c0_12, %c0_13, %c0_14] : memref<2x64x768xbf16, #tpu.memory_space<vmem>>, vector<1x64x768xbf16>
    %38 = vector.shape_cast %37 : vector<1x64x768xbf16> to vector<64x768xbf16>
    %39 = arith.truncf %25 : vector<16x64xf32> to vector<16x64xbf16>
    %cst_15 = arith.constant dense<0.000000e+00> : vector<16x768xf32>
    %40 = tpu.matmul %39, %38, %cst_15 {dimension_numbers = #tpu.dot_dimension_numbers<[1], [0], [0], [1], [0, 0, 1, 1], [], []>} : vector<16x64xbf16>, vector<64x768xbf16>, vector<16x768xf32> -> vector<16x768xf32>
    %41 = vector.broadcast %29 : vector<1x768xf32> to vector<16x768xf32>
    %42 = arith.addf %40, %41 : vector<16x768xf32>
    %c0_16 = arith.constant 0 : index
    %c0_17 = arith.constant 0 : index
    %c0_18 = arith.constant 0 : index
    %c0_19 = arith.constant 0 : index
    %43 = vector.load %arg3[%c0_16, %c0_17, %c0_18, %c0_19] : memref<2x2x128x64xbf16, #tpu.memory_space<vmem>>, vector<1x2x128x64xbf16>
    %44 = vector.shape_cast %43 : vector<1x2x128x64xbf16> to vector<2x128x64xbf16>
    %45 = vector.extract_strided_slice %42 {offsets = [0, 0], sizes = [16, 128], strides = [1, 1]} : vector<16x768xf32> to vector<16x128xf32>
    %46 = vector.extract_strided_slice %42 {offsets = [0, 256], sizes = [16, 128], strides = [1, 1]} : vector<16x768xf32> to vector<16x128xf32>
    %47 = vector.extract_strided_slice %42 {offsets = [0, 512], sizes = [16, 128], strides = [1, 1]} : vector<16x768xf32> to vector<16x128xf32>
    %48 = arith.truncf %45 : vector<16x128xf32> to vector<16x128xbf16>
    %49 = arith.truncf %46 : vector<16x128xf32> to vector<16x128xbf16>
    %cst_20 = arith.constant dense<0.000000e+00> : vector<16x16xf32>
    %50 = tpu.matmul %48, %49, %cst_20 {dimension_numbers = #tpu.dot_dimension_numbers<[1], [1], [0], [0], [0, 0, 1, 0], [], []>} : vector<16x128xbf16>, vector<16x128xbf16>, vector<16x16xf32> -> vector<16x16xf32>
    %51 = arith.addf %50, %26 : vector<16x16xf32>
    %cst_21 = arith.constant dense<0xFF800000> : vector<16xf32>
    %52 = vector.multi_reduction <maximumf>, %51, %cst_21 [1] : vector<16x16xf32> to vector<16xf32>
    %53 = vector.shape_cast %52 : vector<16xf32> to vector<16x1xf32>
    %54 = vector.broadcast %53 : vector<16x1xf32> to vector<16x16xf32>
    %55 = arith.subf %51, %54 : vector<16x16xf32>
    %56 = math.exp %55 : vector<16x16xf32>
    %cst_22 = arith.constant dense<0.000000e+00> : vector<16xf32>
    %57 = vector.multi_reduction <add>, %56, %cst_22 [1] : vector<16x16xf32> to vector<16xf32>
    %58 = vector.shape_cast %57 : vector<16xf32> to vector<16x1xf32>
    %59 = tpu.reciprocal %58 {approx = true} : vector<16x1xf32> -> vector<16x1xf32>
    %60 = vector.broadcast %59 : vector<16x1xf32> to vector<16x16xf32>
    %61 = arith.mulf %56, %60 : vector<16x16xf32>
    %62 = arith.truncf %47 : vector<16x128xf32> to vector<16x128xbf16>
    %63 = arith.truncf %61 : vector<16x16xf32> to vector<16x16xbf16>
    %cst_23 = arith.constant dense<0.000000e+00> : vector<16x128xf32>
    %64 = tpu.matmul %63, %62, %cst_23 {dimension_numbers = #tpu.dot_dimension_numbers<[1], [0], [0], [1], [0, 0, 1, 1], [], []>} : vector<16x16xbf16>, vector<16x128xbf16>, vector<16x128xf32> -> vector<16x128xf32>
    %65 = vector.extract_strided_slice %44 {offsets = [0, 0, 0], sizes = [1, 128, 64], strides = [1, 1, 1]} : vector<2x128x64xbf16> to vector<1x128x64xbf16>
    %66 = vector.shape_cast %65 : vector<1x128x64xbf16> to vector<128x64xbf16>
    %67 = arith.truncf %64 : vector<16x128xf32> to vector<16x128xbf16>
    %cst_24 = arith.constant dense<0.000000e+00> : vector<16x64xf32>
    %68 = tpu.matmul %67, %66, %cst_24 {dimension_numbers = #tpu.dot_dimension_numbers<[1], [0], [0], [1], [0, 0, 1, 1], [], []>} : vector<16x128xbf16>, vector<128x64xbf16>, vector<16x64xf32> -> vector<16x64xf32>
    %69 = vector.extract_strided_slice %42 {offsets = [0, 128], sizes = [16, 128], strides = [1, 1]} : vector<16x768xf32> to vector<16x128xf32>
    %70 = vector.extract_strided_slice %42 {offsets = [0, 384], sizes = [16, 128], strides = [1, 1]} : vector<16x768xf32> to vector<16x128xf32>
    %71 = vector.extract_strided_slice %42 {offsets = [0, 640], sizes = [16, 128], strides = [1, 1]} : vector<16x768xf32> to vector<16x128xf32>
    %72 = arith.truncf %69 : vector<16x128xf32> to vector<16x128xbf16>
    %73 = arith.truncf %70 : vector<16x128xf32> to vector<16x128xbf16>
    %cst_25 = arith.constant dense<0.000000e+00> : vector<16x16xf32>
    %74 = tpu.matmul %72, %73, %cst_25 {dimension_numbers = #tpu.dot_dimension_numbers<[1], [1], [0], [0], [0, 0, 1, 0], [], []>} : vector<16x128xbf16>, vector<16x128xbf16>, vector<16x16xf32> -> vector<16x16xf32>
    %75 = arith.addf %74, %26 : vector<16x16xf32>
    %cst_26 = arith.constant dense<0xFF800000> : vector<16xf32>
    %76 = vector.multi_reduction <maximumf>, %75, %cst_26 [1] : vector<16x16xf32> to vector<16xf32>
    %77 = vector.shape_cast %76 : vector<16xf32> to vector<16x1xf32>
    %78 = vector.broadcast %77 : vector<16x1xf32> to vector<16x16xf32>
    %79 = arith.subf %75, %78 : vector<16x16xf32>
    %80 = math.exp %79 : vector<16x16xf32>
    %cst_27 = arith.constant dense<0.000000e+00> : vector<16xf32>
    %81 = vector.multi_reduction <add>, %80, %cst_27 [1] : vector<16x16xf32> to vector<16xf32>
    %82 = vector.shape_cast %81 : vector<16xf32> to vector<16x1xf32>
    %83 = tpu.reciprocal %82 {approx = true} : vector<16x1xf32> -> vector<16x1xf32>
    %84 = vector.broadcast %83 : vector<16x1xf32> to vector<16x16xf32>
    %85 = arith.mulf %80, %84 : vector<16x16xf32>
    %86 = arith.truncf %71 : vector<16x128xf32> to vector<16x128xbf16>
    %87 = arith.truncf %85 : vector<16x16xf32> to vector<16x16xbf16>
    %cst_28 = arith.constant dense<0.000000e+00> : vector<16x128xf32>
    %88 = tpu.matmul %87, %86, %cst_28 {dimension_numbers = #tpu.dot_dimension_numbers<[1], [0], [0], [1], [0, 0, 1, 1], [], []>} : vector<16x16xbf16>, vector<16x128xbf16>, vector<16x128xf32> -> vector<16x128xf32>
    %89 = vector.extract_strided_slice %44 {offsets = [1, 0, 0], sizes = [1, 128, 64], strides = [1, 1, 1]} : vector<2x128x64xbf16> to vector<1x128x64xbf16>
    %90 = vector.shape_cast %89 : vector<1x128x64xbf16> to vector<128x64xbf16>
    %91 = arith.truncf %88 : vector<16x128xf32> to vector<16x128xbf16>
    %cst_29 = arith.constant dense<0.000000e+00> : vector<16x64xf32>
    %92 = tpu.matmul %91, %90, %cst_29 {dimension_numbers = #tpu.dot_dimension_numbers<[1], [0], [0], [1], [0, 0, 1, 1], [], []>} : vector<16x128xbf16>, vector<128x64xbf16>, vector<16x64xf32> -> vector<16x64xf32>
    %93 = arith.addf %68, %92 : vector<16x64xf32>
    %94 = vector.broadcast %30 : vector<1x64xf32> to vector<16x64xf32>
    %95 = arith.addf %93, %94 : vector<16x64xf32>
    %96 = arith.addf %95, %25 : vector<16x64xf32>
    %cst_30 = arith.constant dense<0.000000e+00> : vector<16xf32>
    %97 = vector.multi_reduction <add>, %96, %cst_30 [1] : vector<16x64xf32> to vector<16xf32>
    %98 = vector.shape_cast %97 : vector<16xf32> to vector<16x1xf32>
    %cst_31 = arith.constant 6.400000e+01 : f32
    %99 = vector.broadcast %cst_31 : f32 to vector<16x1xf32>
    %100 = arith.divf %98, %99 : vector<16x1xf32>
    %101 = vector.broadcast %100 : vector<16x1xf32> to vector<16x64xf32>
    %102 = arith.subf %96, %101 : vector<16x64xf32>
    %103 = arith.mulf %102, %102 : vector<16x64xf32>
    %cst_32 = arith.constant dense<0.000000e+00> : vector<16xf32>
    %104 = vector.multi_reduction <add>, %103, %cst_32 [1] : vector<16x64xf32> to vector<16xf32>
    %105 = vector.shape_cast %104 : vector<16xf32> to vector<16x1xf32>
    %cst_33 = arith.constant 6.400000e+01 : f32
    %106 = vector.broadcast %cst_33 : f32 to vector<16x1xf32>
    %107 = arith.divf %105, %106 : vector<16x1xf32>
    %cst_34 = arith.constant 9.99999996E-13 : f32
    %108 = vector.broadcast %cst_34 : f32 to vector<16x1xf32>
    %109 = arith.addf %107, %108 : vector<16x1xf32>
    %110 = math.rsqrt %109 : vector<16x1xf32>
    %111 = vector.broadcast %110 : vector<16x1xf32> to vector<16x64xf32>
    %112 = arith.mulf %102, %111 : vector<16x64xf32>
    %113 = vector.broadcast %31 : vector<1x64xf32> to vector<16x64xf32>
    %114 = arith.mulf %112, %113 : vector<16x64xf32>
    %115 = vector.broadcast %32 : vector<1x64xf32> to vector<16x64xf32>
    %116 = arith.addf %114, %115 : vector<16x64xf32>
    %c0_35 = arith.constant 0 : index
    %c0_36 = arith.constant 0 : index
    %c0_37 = arith.constant 0 : index
    %117 = vector.load %arg4[%c0_35, %c0_36, %c0_37] : memref<2x64x128xbf16, #tpu.memory_space<vmem>>, vector<1x64x128xbf16>
    %118 = vector.shape_cast %117 : vector<1x64x128xbf16> to vector<64x128xbf16>
    %119 = arith.truncf %116 : vector<16x64xf32> to vector<16x64xbf16>
    %cst_38 = arith.constant dense<0.000000e+00> : vector<16x128xf32>
    %120 = tpu.matmul %119, %118, %cst_38 {dimension_numbers = #tpu.dot_dimension_numbers<[1], [0], [0], [1], [0, 0, 1, 1], [], []>} : vector<16x64xbf16>, vector<64x128xbf16>, vector<16x128xf32> -> vector<16x128xf32>
    %121 = vector.broadcast %33 : vector<1x128xf32> to vector<16x128xf32>
    %122 = arith.addf %120, %121 : vector<16x128xf32>
    %123 = arith.mulf %122, %122 : vector<16x128xf32>
    %124 = arith.mulf %122, %123 : vector<16x128xf32>
    %cst_39 = arith.constant 4.471500e-02 : f32
    %125 = vector.broadcast %cst_39 : f32 to vector<16x128xf32>
    %126 = arith.mulf %125, %124 : vector<16x128xf32>
    %127 = arith.addf %122, %126 : vector<16x128xf32>
    %cst_40 = arith.constant 0.797884583 : f32
    %128 = vector.broadcast %cst_40 : f32 to vector<16x128xf32>
    %129 = arith.mulf %128, %127 : vector<16x128xf32>
    %130 = math.tanh %129 : vector<16x128xf32>
    %cst_41 = arith.constant 1.000000e+00 : f32
    %131 = vector.broadcast %cst_41 : f32 to vector<16x128xf32>
    %132 = arith.addf %131, %130 : vector<16x128xf32>
    %cst_42 = arith.constant 5.000000e-01 : f32
    %133 = vector.broadcast %cst_42 : f32 to vector<16x128xf32>
    %134 = arith.mulf %133, %132 : vector<16x128xf32>
    %135 = arith.mulf %122, %134 : vector<16x128xf32>
    %c0_43 = arith.constant 0 : index
    %c0_44 = arith.constant 0 : index
    %c0_45 = arith.constant 0 : index
    %136 = vector.load %arg5[%c0_43, %c0_44, %c0_45] : memref<2x128x64xbf16, #tpu.memory_space<vmem>>, vector<1x128x64xbf16>
    %137 = vector.shape_cast %136 : vector<1x128x64xbf16> to vector<128x64xbf16>
    %138 = arith.truncf %135 : vector<16x128xf32> to vector<16x128xbf16>
    %cst_46 = arith.constant dense<0.000000e+00> : vector<16x64xf32>
    %139 = tpu.matmul %138, %137, %cst_46 {dimension_numbers = #tpu.dot_dimension_numbers<[1], [0], [0], [1], [0, 0, 1, 1], [], []>} : vector<16x128xbf16>, vector<128x64xbf16>, vector<16x64xf32> -> vector<16x64xf32>
    %140 = vector.broadcast %34 : vector<1x64xf32> to vector<16x64xf32>
    %141 = arith.addf %139, %140 : vector<16x64xf32>
    %142 = arith.addf %141, %116 : vector<16x64xf32>
    %cst_47 = arith.constant dense<0.000000e+00> : vector<16xf32>
    %143 = vector.multi_reduction <add>, %142, %cst_47 [1] : vector<16x64xf32> to vector<16xf32>
    %144 = vector.shape_cast %143 : vector<16xf32> to vector<16x1xf32>
    %cst_48 = arith.constant 6.400000e+01 : f32
    %145 = vector.broadcast %cst_48 : f32 to vector<16x1xf32>
    %146 = arith.divf %144, %145 : vector<16x1xf32>
    %147 = vector.broadcast %146 : vector<16x1xf32> to vector<16x64xf32>
    %148 = arith.subf %142, %147 : vector<16x64xf32>
    %149 = arith.mulf %148, %148 : vector<16x64xf32>
    %cst_49 = arith.constant dense<0.000000e+00> : vector<16xf32>
    %150 = vector.multi_reduction <add>, %149, %cst_49 [1] : vector<16x64xf32> to vector<16xf32>
    %151 = vector.shape_cast %150 : vector<16xf32> to vector<16x1xf32>
    %cst_50 = arith.constant 6.400000e+01 : f32
    %152 = vector.broadcast %cst_50 : f32 to vector<16x1xf32>
    %153 = arith.divf %151, %152 : vector<16x1xf32>
    %cst_51 = arith.constant 9.99999996E-13 : f32
    %154 = vector.broadcast %cst_51 : f32 to vector<16x1xf32>
    %155 = arith.addf %153, %154 : vector<16x1xf32>
    %156 = math.rsqrt %155 : vector<16x1xf32>
    %157 = vector.broadcast %156 : vector<16x1xf32> to vector<16x64xf32>
    %158 = arith.mulf %148, %157 : vector<16x64xf32>
    %159 = vector.broadcast %35 : vector<1x64xf32> to vector<16x64xf32>
    %160 = arith.mulf %158, %159 : vector<16x64xf32>
    %161 = vector.broadcast %36 : vector<1x64xf32> to vector<16x64xf32>
    %162 = arith.addf %160, %161 : vector<16x64xf32>
    %c1 = arith.constant 1 : index
    %c0_52 = arith.constant 0 : index
    %c0_53 = arith.constant 0 : index
    %163 = vector.load %arg8[%c1, %c0_52, %c0_53] : memref<2x8x768xf32, #tpu.memory_space<vmem>>, vector<1x8x768xf32>
    %164 = vector.shape_cast %163 : vector<1x8x768xf32> to vector<8x768xf32>
    %165 = vector.extract_strided_slice %164 {offsets = [0, 0], sizes = [1, 768], strides = [1, 1]} : vector<8x768xf32> to vector<1x768xf32>
    %166 = vector.extract_strided_slice %164 {offsets = [1, 0], sizes = [1, 64], strides = [1, 1]} : vector<8x768xf32> to vector<1x64xf32>
    %167 = vector.extract_strided_slice %164 {offsets = [2, 0], sizes = [1, 64], strides = [1, 1]} : vector<8x768xf32> to vector<1x64xf32>
    %168 = vector.extract_strided_slice %164 {offsets = [3, 0], sizes = [1, 64], strides = [1, 1]} : vector<8x768xf32> to vector<1x64xf32>
    %169 = vector.extract_strided_slice %164 {offsets = [4, 0], sizes = [1, 128], strides = [1, 1]} : vector<8x768xf32> to vector<1x128xf32>
    %170 = vector.extract_strided_slice %164 {offsets = [5, 0], sizes = [1, 64], strides = [1, 1]} : vector<8x768xf32> to vector<1x64xf32>
    %171 = vector.extract_strided_slice %164 {offsets = [6, 0], sizes = [1, 64], strides = [1, 1]} : vector<8x768xf32> to vector<1x64xf32>
    %172 = vector.extract_strided_slice %164 {offsets = [7, 0], sizes = [1, 64], strides = [1, 1]} : vector<8x768xf32> to vector<1x64xf32>
    %c1_54 = arith.constant 1 : index
    %c0_55 = arith.constant 0 : index
    %c0_56 = arith.constant 0 : index
    %173 = vector.load %arg2[%c1_54, %c0_55, %c0_56] : memref<2x64x768xbf16, #tpu.memory_space<vmem>>, vector<1x64x768xbf16>
    %174 = vector.shape_cast %173 : vector<1x64x768xbf16> to vector<64x768xbf16>
    %175 = arith.truncf %162 : vector<16x64xf32> to vector<16x64xbf16>
    %cst_57 = arith.constant dense<0.000000e+00> : vector<16x768xf32>
    %176 = tpu.matmul %175, %174, %cst_57 {dimension_numbers = #tpu.dot_dimension_numbers<[1], [0], [0], [1], [0, 0, 1, 1], [], []>} : vector<16x64xbf16>, vector<64x768xbf16>, vector<16x768xf32> -> vector<16x768xf32>
    %177 = vector.broadcast %165 : vector<1x768xf32> to vector<16x768xf32>
    %178 = arith.addf %176, %177 : vector<16x768xf32>
    %c1_58 = arith.constant 1 : index
    %c0_59 = arith.constant 0 : index
    %c0_60 = arith.constant 0 : index
    %c0_61 = arith.constant 0 : index
    %179 = vector.load %arg3[%c1_58, %c0_59, %c0_60, %c0_61] : memref<2x2x128x64xbf16, #tpu.memory_space<vmem>>, vector<1x2x128x64xbf16>
    %180 = vector.shape_cast %179 : vector<1x2x128x64xbf16> to vector<2x128x64xbf16>
    %181 = vector.extract_strided_slice %178 {offsets = [0, 0], sizes = [16, 128], strides = [1, 1]} : vector<16x768xf32> to vector<16x128xf32>
    %182 = vector.extract_strided_slice %178 {offsets = [0, 256], sizes = [16, 128], strides = [1, 1]} : vector<16x768xf32> to vector<16x128xf32>
    %183 = vector.extract_strided_slice %178 {offsets = [0, 512], sizes = [16, 128], strides = [1, 1]} : vector<16x768xf32> to vector<16x128xf32>
    %184 = arith.truncf %181 : vector<16x128xf32> to vector<16x128xbf16>
    %185 = arith.truncf %182 : vector<16x128xf32> to vector<16x128xbf16>
    %cst_62 = arith.constant dense<0.000000e+00> : vector<16x16xf32>
    %186 = tpu.matmul %184, %185, %cst_62 {dimension_numbers = #tpu.dot_dimension_numbers<[1], [1], [0], [0], [0, 0, 1, 0], [], []>} : vector<16x128xbf16>, vector<16x128xbf16>, vector<16x16xf32> -> vector<16x16xf32>
    %187 = arith.addf %186, %26 : vector<16x16xf32>
    %cst_63 = arith.constant dense<0xFF800000> : vector<16xf32>
    %188 = vector.multi_reduction <maximumf>, %187, %cst_63 [1] : vector<16x16xf32> to vector<16xf32>
    %189 = vector.shape_cast %188 : vector<16xf32> to vector<16x1xf32>
    %190 = vector.broadcast %189 : vector<16x1xf32> to vector<16x16xf32>
    %191 = arith.subf %187, %190 : vector<16x16xf32>
    %192 = math.exp %191 : vector<16x16xf32>
    %cst_64 = arith.constant dense<0.000000e+00> : vector<16xf32>
    %193 = vector.multi_reduction <add>, %192, %cst_64 [1] : vector<16x16xf32> to vector<16xf32>
    %194 = vector.shape_cast %193 : vector<16xf32> to vector<16x1xf32>
    %195 = tpu.reciprocal %194 {approx = true} : vector<16x1xf32> -> vector<16x1xf32>
    %196 = vector.broadcast %195 : vector<16x1xf32> to vector<16x16xf32>
    %197 = arith.mulf %192, %196 : vector<16x16xf32>
    %198 = arith.truncf %183 : vector<16x128xf32> to vector<16x128xbf16>
    %199 = arith.truncf %197 : vector<16x16xf32> to vector<16x16xbf16>
    %cst_65 = arith.constant dense<0.000000e+00> : vector<16x128xf32>
    %200 = tpu.matmul %199, %198, %cst_65 {dimension_numbers = #tpu.dot_dimension_numbers<[1], [0], [0], [1], [0, 0, 1, 1], [], []>} : vector<16x16xbf16>, vector<16x128xbf16>, vector<16x128xf32> -> vector<16x128xf32>
    %201 = vector.extract_strided_slice %180 {offsets = [0, 0, 0], sizes = [1, 128, 64], strides = [1, 1, 1]} : vector<2x128x64xbf16> to vector<1x128x64xbf16>
    %202 = vector.shape_cast %201 : vector<1x128x64xbf16> to vector<128x64xbf16>
    %203 = arith.truncf %200 : vector<16x128xf32> to vector<16x128xbf16>
    %cst_66 = arith.constant dense<0.000000e+00> : vector<16x64xf32>
    %204 = tpu.matmul %203, %202, %cst_66 {dimension_numbers = #tpu.dot_dimension_numbers<[1], [0], [0], [1], [0, 0, 1, 1], [], []>} : vector<16x128xbf16>, vector<128x64xbf16>, vector<16x64xf32> -> vector<16x64xf32>
    %205 = vector.extract_strided_slice %178 {offsets = [0, 128], sizes = [16, 128], strides = [1, 1]} : vector<16x768xf32> to vector<16x128xf32>
    %206 = vector.extract_strided_slice %178 {offsets = [0, 384], sizes = [16, 128], strides = [1, 1]} : vector<16x768xf32> to vector<16x128xf32>
    %207 = vector.extract_strided_slice %178 {offsets = [0, 640], sizes = [16, 128], strides = [1, 1]} : vector<16x768xf32> to vector<16x128xf32>
    %208 = arith.truncf %205 : vector<16x128xf32> to vector<16x128xbf16>
    %209 = arith.truncf %206 : vector<16x128xf32> to vector<16x128xbf16>
    %cst_67 = arith.constant dense<0.000000e+00> : vector<16x16xf32>
    %210 = tpu.matmul %208, %209, %cst_67 {dimension_numbers = #tpu.dot_dimension_numbers<[1], [1], [0], [0], [0, 0, 1, 0], [], []>} : vector<16x128xbf16>, vector<16x128xbf16>, vector<16x16xf32> -> vector<16x16xf32>
    %211 = arith.addf %210, %26 : vector<16x16xf32>
    %cst_68 = arith.constant dense<0xFF800000> : vector<16xf32>
    %212 = vector.multi_reduction <maximumf>, %211, %cst_68 [1] : vector<16x16xf32> to vector<16xf32>
    %213 = vector.shape_cast %212 : vector<16xf32> to vector<16x1xf32>
    %214 = vector.broadcast %213 : vector<16x1xf32> to vector<16x16xf32>
    %215 = arith.subf %211, %214 : vector<16x16xf32>
    %216 = math.exp %215 : vector<16x16xf32>
    %cst_69 = arith.constant dense<0.000000e+00> : vector<16xf32>
    %217 = vector.multi_reduction <add>, %216, %cst_69 [1] : vector<16x16xf32> to vector<16xf32>
    %218 = vector.shape_cast %217 : vector<16xf32> to vector<16x1xf32>
    %219 = tpu.reciprocal %218 {approx = true} : vector<16x1xf32> -> vector<16x1xf32>
    %220 = vector.broadcast %219 : vector<16x1xf32> to vector<16x16xf32>
    %221 = arith.mulf %216, %220 : vector<16x16xf32>
    %222 = arith.truncf %207 : vector<16x128xf32> to vector<16x128xbf16>
    %223 = arith.truncf %221 : vector<16x16xf32> to vector<16x16xbf16>
    %cst_70 = arith.constant dense<0.000000e+00> : vector<16x128xf32>
    %224 = tpu.matmul %223, %222, %cst_70 {dimension_numbers = #tpu.dot_dimension_numbers<[1], [0], [0], [1], [0, 0, 1, 1], [], []>} : vector<16x16xbf16>, vector<16x128xbf16>, vector<16x128xf32> -> vector<16x128xf32>
    %225 = vector.extract_strided_slice %180 {offsets = [1, 0, 0], sizes = [1, 128, 64], strides = [1, 1, 1]} : vector<2x128x64xbf16> to vector<1x128x64xbf16>
    %226 = vector.shape_cast %225 : vector<1x128x64xbf16> to vector<128x64xbf16>
    %227 = arith.truncf %224 : vector<16x128xf32> to vector<16x128xbf16>
    %cst_71 = arith.constant dense<0.000000e+00> : vector<16x64xf32>
    %228 = tpu.matmul %227, %226, %cst_71 {dimension_numbers = #tpu.dot_dimension_numbers<[1], [0], [0], [1], [0, 0, 1, 1], [], []>} : vector<16x128xbf16>, vector<128x64xbf16>, vector<16x64xf32> -> vector<16x64xf32>
    %229 = arith.addf %204, %228 : vector<16x64xf32>
    %230 = vector.broadcast %166 : vector<1x64xf32> to vector<16x64xf32>
    %231 = arith.addf %229, %230 : vector<16x64xf32>
    %232 = arith.addf %231, %162 : vector<16x64xf32>
    %cst_72 = arith.constant dense<0.000000e+00> : vector<16xf32>
    %233 = vector.multi_reduction <add>, %232, %cst_72 [1] : vector<16x64xf32> to vector<16xf32>
    %234 = vector.shape_cast %233 : vector<16xf32> to vector<16x1xf32>
    %cst_73 = arith.constant 6.400000e+01 : f32
    %235 = vector.broadcast %cst_73 : f32 to vector<16x1xf32>
    %236 = arith.divf %234, %235 : vector<16x1xf32>
    %237 = vector.broadcast %236 : vector<16x1xf32> to vector<16x64xf32>
    %238 = arith.subf %232, %237 : vector<16x64xf32>
    %239 = arith.mulf %238, %238 : vector<16x64xf32>
    %cst_74 = arith.constant dense<0.000000e+00> : vector<16xf32>
    %240 = vector.multi_reduction <add>, %239, %cst_74 [1] : vector<16x64xf32> to vector<16xf32>
    %241 = vector.shape_cast %240 : vector<16xf32> to vector<16x1xf32>
    %cst_75 = arith.constant 6.400000e+01 : f32
    %242 = vector.broadcast %cst_75 : f32 to vector<16x1xf32>
    %243 = arith.divf %241, %242 : vector<16x1xf32>
    %cst_76 = arith.constant 9.99999996E-13 : f32
    %244 = vector.broadcast %cst_76 : f32 to vector<16x1xf32>
    %245 = arith.addf %243, %244 : vector<16x1xf32>
    %246 = math.rsqrt %245 : vector<16x1xf32>
    %247 = vector.broadcast %246 : vector<16x1xf32> to vector<16x64xf32>
    %248 = arith.mulf %238, %247 : vector<16x64xf32>
    %249 = vector.broadcast %167 : vector<1x64xf32> to vector<16x64xf32>
    %250 = arith.mulf %248, %249 : vector<16x64xf32>
    %251 = vector.broadcast %168 : vector<1x64xf32> to vector<16x64xf32>
    %252 = arith.addf %250, %251 : vector<16x64xf32>
    %c1_77 = arith.constant 1 : index
    %c0_78 = arith.constant 0 : index
    %c0_79 = arith.constant 0 : index
    %253 = vector.load %arg4[%c1_77, %c0_78, %c0_79] : memref<2x64x128xbf16, #tpu.memory_space<vmem>>, vector<1x64x128xbf16>
    %254 = vector.shape_cast %253 : vector<1x64x128xbf16> to vector<64x128xbf16>
    %255 = arith.truncf %252 : vector<16x64xf32> to vector<16x64xbf16>
    %cst_80 = arith.constant dense<0.000000e+00> : vector<16x128xf32>
    %256 = tpu.matmul %255, %254, %cst_80 {dimension_numbers = #tpu.dot_dimension_numbers<[1], [0], [0], [1], [0, 0, 1, 1], [], []>} : vector<16x64xbf16>, vector<64x128xbf16>, vector<16x128xf32> -> vector<16x128xf32>
    %257 = vector.broadcast %169 : vector<1x128xf32> to vector<16x128xf32>
    %258 = arith.addf %256, %257 : vector<16x128xf32>
    %259 = arith.mulf %258, %258 : vector<16x128xf32>
    %260 = arith.mulf %258, %259 : vector<16x128xf32>
    %cst_81 = arith.constant 4.471500e-02 : f32
    %261 = vector.broadcast %cst_81 : f32 to vector<16x128xf32>
    %262 = arith.mulf %261, %260 : vector<16x128xf32>
    %263 = arith.addf %258, %262 : vector<16x128xf32>
    %cst_82 = arith.constant 0.797884583 : f32
    %264 = vector.broadcast %cst_82 : f32 to vector<16x128xf32>
    %265 = arith.mulf %264, %263 : vector<16x128xf32>
    %266 = math.tanh %265 : vector<16x128xf32>
    %cst_83 = arith.constant 1.000000e+00 : f32
    %267 = vector.broadcast %cst_83 : f32 to vector<16x128xf32>
    %268 = arith.addf %267, %266 : vector<16x128xf32>
    %cst_84 = arith.constant 5.000000e-01 : f32
    %269 = vector.broadcast %cst_84 : f32 to vector<16x128xf32>
    %270 = arith.mulf %269, %268 : vector<16x128xf32>
    %271 = arith.mulf %258, %270 : vector<16x128xf32>
    %c1_85 = arith.constant 1 : index
    %c0_86 = arith.constant 0 : index
    %c0_87 = arith.constant 0 : index
    %272 = vector.load %arg5[%c1_85, %c0_86, %c0_87] : memref<2x128x64xbf16, #tpu.memory_space<vmem>>, vector<1x128x64xbf16>
    %273 = vector.shape_cast %272 : vector<1x128x64xbf16> to vector<128x64xbf16>
    %274 = arith.truncf %271 : vector<16x128xf32> to vector<16x128xbf16>
    %cst_88 = arith.constant dense<0.000000e+00> : vector<16x64xf32>
    %275 = tpu.matmul %274, %273, %cst_88 {dimension_numbers = #tpu.dot_dimension_numbers<[1], [0], [0], [1], [0, 0, 1, 1], [], []>} : vector<16x128xbf16>, vector<128x64xbf16>, vector<16x64xf32> -> vector<16x64xf32>
    %276 = vector.broadcast %170 : vector<1x64xf32> to vector<16x64xf32>
    %277 = arith.addf %275, %276 : vector<16x64xf32>
    %278 = arith.addf %277, %252 : vector<16x64xf32>
    %cst_89 = arith.constant dense<0.000000e+00> : vector<16xf32>
    %279 = vector.multi_reduction <add>, %278, %cst_89 [1] : vector<16x64xf32> to vector<16xf32>
    %280 = vector.shape_cast %279 : vector<16xf32> to vector<16x1xf32>
    %cst_90 = arith.constant 6.400000e+01 : f32
    %281 = vector.broadcast %cst_90 : f32 to vector<16x1xf32>
    %282 = arith.divf %280, %281 : vector<16x1xf32>
    %283 = vector.broadcast %282 : vector<16x1xf32> to vector<16x64xf32>
    %284 = arith.subf %278, %283 : vector<16x64xf32>
    %285 = arith.mulf %284, %284 : vector<16x64xf32>
    %cst_91 = arith.constant dense<0.000000e+00> : vector<16xf32>
    %286 = vector.multi_reduction <add>, %285, %cst_91 [1] : vector<16x64xf32> to vector<16xf32>
    %287 = vector.shape_cast %286 : vector<16xf32> to vector<16x1xf32>
    %cst_92 = arith.constant 6.400000e+01 : f32
    %288 = vector.broadcast %cst_92 : f32 to vector<16x1xf32>
    %289 = arith.divf %287, %288 : vector<16x1xf32>
    %cst_93 = arith.constant 9.99999996E-13 : f32
    %290 = vector.broadcast %cst_93 : f32 to vector<16x1xf32>
    %291 = arith.addf %289, %290 : vector<16x1xf32>
    %292 = math.rsqrt %291 : vector<16x1xf32>
    %293 = vector.broadcast %292 : vector<16x1xf32> to vector<16x64xf32>
    %294 = arith.mulf %284, %293 : vector<16x64xf32>
    %295 = vector.broadcast %171 : vector<1x64xf32> to vector<16x64xf32>
    %296 = arith.mulf %294, %295 : vector<16x64xf32>
    %297 = vector.broadcast %172 : vector<1x64xf32> to vector<16x64xf32>
    %298 = arith.addf %296, %297 : vector<16x64xf32>
    %299 = vector.extract_strided_slice %298 {offsets = [0, 0], sizes = [1, 64], strides = [1, 1]} : vector<16x64xf32> to vector<1x64xf32>
    %300 = vector.extract_strided_slice %298 {offsets = [8, 0], sizes = [1, 64], strides = [1, 1]} : vector<16x64xf32> to vector<1x64xf32>
    %301 = tpu.concatenate %299, %300 in 0 : vector<1x64xf32>, vector<1x64xf32> -> vector<2x64xf32>
    %c0_94 = arith.constant 0 : index
    %c0_95 = arith.constant 0 : index
    %302 = vector.load %arg6[%c0_94, %c0_95] : memref<64x64xbf16, #tpu.memory_space<vmem>>, vector<64x64xbf16>
    %303 = arith.truncf %301 : vector<2x64xf32> to vector<2x64xbf16>
    %cst_96 = arith.constant dense<0.000000e+00> : vector<2x64xf32>
    %304 = tpu.matmul %303, %302, %cst_96 {dimension_numbers = #tpu.dot_dimension_numbers<[1], [0], [0], [1], [0, 0, 1, 1], [], []>} : vector<2x64xbf16>, vector<64x64xbf16>, vector<2x64xf32> -> vector<2x64xf32>
    %305 = vector.broadcast %3 : vector<1x64xf32> to vector<2x64xf32>
    %306 = arith.addf %304, %305 : vector<2x64xf32>
    %307 = math.tanh %306 : vector<2x64xf32>
    %c0_97 = arith.constant 0 : index
    %c0_98 = arith.constant 0 : index
    %308 = vector.load %arg7[%c0_97, %c0_98] : memref<64x128xbf16, #tpu.memory_space<vmem>>, vector<64x128xbf16>
    %309 = arith.truncf %307 : vector<2x64xf32> to vector<2x64xbf16>
    %cst_99 = arith.constant dense<0.000000e+00> : vector<2x128xf32>
    %310 = tpu.matmul %309, %308, %cst_99 {dimension_numbers = #tpu.dot_dimension_numbers<[1], [0], [0], [1], [0, 0, 1, 1], [], []>} : vector<2x64xbf16>, vector<64x128xbf16>, vector<2x128xf32> -> vector<2x128xf32>
    %311 = vector.broadcast %4 : vector<1x128xf32> to vector<2x128xf32>
    %312 = arith.addf %310, %311 : vector<2x128xf32>
    %c0_100 = arith.constant 0 : index
    %c0_101 = arith.constant 0 : index
    %313 = vector.load %arg10[%c0_100, %c0_101] : memref<2x128xf32, #tpu.memory_space<vmem>>, vector<2x128xf32>
    tpu.vector_store %arg10[%c0_100, %c0_101], %312 {strides = array<i32>} : memref<2x128xf32, #tpu.memory_space<vmem>>, vector<2x128xf32>,
    return
  }
}

</mosaic_0001>

<bundles_post_ra>
// kernel: mul.8
= control target key start
LH: loop header
LB: loop body
LE: loop exit
PB: predicated region body
PF: predicated region fallthrough
CT: control target
= control target key end

     0   :  { %vm7_vm0 = vcmask 64512   ;;  %vm13_vm1 = vcmask 130112   ;;  %s39_s0 = inlined_call_operand.vmem [shape: f32[2,8], index: 0, kind: input, shape index: {}]   ;;  %s40_s1 = inlined_call_operand.vmem [shape: f32[16], index: 1, kind: output, shape index: {}]  }
   0x1   :  { %v4_v0 = vld [vmem:[%s39_s0] sm:$0x3]  ;;  %s22_s0 = smov 8  }
   0x2   :  { %5 = vst [vmem:[#allocation1] sm:$0x3] %v4_v0 }
   0x9   :  { %v10_v1 = vld [vmem:[#allocation1 + $0x1] sm:$0x1]   ;;  %v6_v2 = vld [vmem:[#allocation1] sm:$0x1]  }
   0xa   :  { %11 = vrot.lane.b32.xlu0 %v10_v1, %s22_s0  ;;  %8 = vst.msk [vmem:[#allocation0] sm:$0x1] %vm7_vm0, %v6_v2  }
  0x7c   :  { %v12_v3 = vpop.permute.xlu0 %11  }
  0x7d   :  { %14 = vst.msk [vmem:[#allocation0] sm:$0x1] %vm13_vm1, %v12_v3  }
  0x84   :  { %v18_v4 = vld [vmem:[#allocation0] sm:$0x1] }
  0x85   :  { %20 = vst [vmem:[%s40_s1] sm:$0x1] %v18_v4 }

// kernel: bert_text_classifier.1
= control target key start
LH: loop header
LB: loop body
LE: loop exit
PB: predicated region body
PF: predicated region fallthrough
CT: control target
= control target key end

     0   :  { %vm40_vm0 = vcmask 523264   ;;  %s3858_s0 = inlined_call_operand.vmem [shape: f32[16,64], index: 0, kind: input, shape index: {}]   ;;  %s3859_s1 = inlined_call_operand.vmem [shape: f32[16,16], index: 1, kind: input, shape index: {}]   ;;  %s3860_s2 = inlined_call_operand.vmem [shape: bf16[2,64,768], index: 2, kind: input, shape index: {}]   ;;  %s3861_s3 = inlined_call_operand.vmem [shape: bf16[2,2,128,64], index: 3, kind: input, shape index: {}]   ;;  %s3862_s4 = inlined_call_operand.vmem [shape: bf16[2,64,128], index: 4, kind: input, shape index: {}]   ;;  %s3863_s5 = inlined_call_operand.vmem [shape: bf16[2,128,64], index: 5, kind: input, shape index: {}]   ;;  %s3864_s6 = inlined_call_operand.vmem [shape: bf16[64,64], index: 6, kind: input, shape index: {}]   ;;  %s3865_s7 = inlined_call_operand.vmem [shape: bf16[64,128], index: 7, kind: input, shape index: {}]   ;;  %s3866_s8 = inlined_call_operand.vmem [shape: f32[2,8,768], index: 8, kind: input, shape index: {}]   ;;  %s3867_s9 = inlined_call_operand.vmem [shape: f32[4,128], index: 9, kind: input, shape index: {}]   ;;  %s3868_s10 = inlined_call_operand.hbm [shape: f32[2,128], index: 10, kind: output, shape index: {}]  }
   0x1   :  { %v38_v0 = vld [vmem:[%s3858_s0] sm:$0xff]  ;;  %v39_v1 = vld [vmem:[%s3858_s0 + $0x8] sm:$0xff] }
   0x2   :  { %v41_v2 = vsel %vm40_vm0, %v38_v0, 0.0  ;;  %v44_v3 = vsel %vm40_vm0, %v39_v1, 0.0 }
   0x3   :  { %42 = vadd.xlane.f32.xlu0 %v41_v2 }
   0x7   :  { %45 = vadd.xlane.f32.xlu0 %v44_v3 }
   0x8   :  { %15 = vsyncpa [#allocation3], 0  ;;  %v2863_v14 = vld [vmem:[%s3860_s2 + $0x4] ss:$24 sps:$4 sm:$0xff]   ;;  %v2865_v15 = vld [vmem:[%s3860_s2] ss:$24 sps:$4 sm:$0xff]   ;;  %v68_v36 = vlaneseq }
   0x9   :  { %v2866_v16 = vld [vmem:[%s3860_s2 + $0xc] ss:$24 sps:$4 sm:$0xff]   ;;  %260 = vmatprep.subr.bf16.mxu0 %v2863_v14  ;;  %v2868_v17 = vld [vmem:[%s3860_s2 + $0x8] ss:$24 sps:$4 sm:$0xff]   ;;  %v2872_v20 = vld [vmem:[%s3860_s2 + $0x3c] ss:$24 sps:$4 sm:$0xff]  }
   0xa   :  { %261 = vmatpush1.bf16.msra.mxu0 %v2865_v15  ;;  %303 = vmatprep.subr.bf16.mxu1 %v2866_v16  ;;  %v2869_v18 = vld [vmem:[%s3860_s2 + $0x34] ss:$24 sps:$4 sm:$0xff]   ;;  %v2871_v19 = vld [vmem:[%s3860_s2 + $0x30] ss:$24 sps:$4 sm:$0xff]   ;;  %v2875_v22 = vld [vmem:[%s3860_s2 + $0x64] ss:$24 sps:$4 sm:$0xff]  }
   0xb   :  { %304 = vmatpush1.bf16.msra.mxu1 %v2868_v17  ;;  %262 = vmatprep.subr.bf16.mxu0 %v2869_v18  ;;  %v2874_v21 = vld [vmem:[%s3860_s2 + $0x38] ss:$24 sps:$4 sm:$0xff]   ;;  %v2878_v24 = vld [vmem:[%s3860_s2 + $0x6c] ss:$24 sps:$4 sm:$0xff]   ;;  %v2880_v25 = vld [vmem:[%s3860_s2 + $0x68] ss:$24 sps:$4 sm:$0xff]  }
   0xc   :  { %305 = vmatprep.subr.bf16.mxu1 %v2872_v20  ;;  %v2877_v23 = vld [vmem:[%s3860_s2 + $0x60] ss:$24 sps:$4 sm:$0xff]   ;;  %v2881_v26 = vld [vmem:[%s3860_s2 + $0x94] ss:$24 sps:$4 sm:$0xff]   ;;  %v2883_v27 = vld [vmem:[%s3860_s2 + $0x90] ss:$24 sps:$4 sm:$0xff]  }
   0xd   :  { %v2884_v28 = vld [vmem:[%s3860_s2 + $0x9c] ss:$24 sps:$4 sm:$0xff]   ;;  %v2886_v29 = vld [vmem:[%s3860_s2 + $0x98] ss:$24 sps:$4 sm:$0xff]   ;;  %v3086_v31 = vmov 0   ;;  %v3208_v39 = vshrl.u32 %v68_v36, 7 }
   0xe   :  { %263 = vmatpush1.bf16.msra.mxu0 %v2871_v19  ;;  %v2889_v30 = vld [vmem:[%s3860_s2 + $0x14] ss:$24 sps:$4 sm:$0xff]   ;;  %292 = vmatprep.mubr.bf16.mxu0 %v3086_v31  ;;  %v37_v41 = vld [vmem:[%s3867_s9] sm:$0xf]  ;;  %v2887_v53 = vld [vmem:[%s3860_s2 + $0x10] ss:$24 sps:$4 sm:$0xff]  }
   0xf   :  { %306 = vmatpush1.bf16.msra.mxu1 %v2874_v21  ;;  %264 = vmatprep.subr.bf16.mxu0 %v2875_v22  ;;  %v3211_v40 = vsub.s32 0, %v3208_v39  ;;  %v3218_v45 = vsub.s32 1, %v3208_v39  ;;  %v2892_v55 = vld [vmem:[%s3860_s2 + $0x44] ss:$24 sps:$4 sm:$0xff]   ;;  %v2890_v56 = vld [vmem:[%s3860_s2 + $0x40] ss:$24 sps:$4 sm:$0xff]  }
  0x10   :  { %307 = vmatprep.subr.bf16.mxu1 %v2878_v24  ;;  %335 = vmatprep.mubr.bf16.mxu1 %v3086_v31  ;;  %v2895_v57 = vld [vmem:[%s3860_s2 + $0x74] ss:$24 sps:$4 sm:$0xff]   ;;  %v2893_v58 = vld [vmem:[%s3860_s2 + $0x70] ss:$24 sps:$4 sm:$0xff]   ;;  %v2898_v59 = vld [vmem:[%s3860_s2 + $0xa4] ss:$24 sps:$4 sm:$0xff]  }
  0x11   :  { %v71_v44 = vrot.slane %v37_v41, %v3211_v40  ;;  %v77_v49 = vrot.slane %v37_v41, %v3218_v45  ;;  %v2896_v60 = vld [vmem:[%s3860_s2 + $0xa0] ss:$24 sps:$4 sm:$0xff]   ;;  %v3087_v61 = vmov 0.0   ;;  %vm3088_vm1 = vmmov 0   ;;  %v84_v63 = vld [vmem:[%s3866_s8 + $0x10] sm:$0xff] }
  0x12   :  { %265 = vmatpush1.bf16.msra.mxu0 %v2877_v23  ;;  %v3261_v62 = vld [vmem:[%s3866_s8] sm:$0xff]  ;;  %v124_v3 = vrot.slane %v84_v63, %v3211_v40  ;;  %vm464_vm2 = vcmask 130048   ;;  %vm2163_vm3 = vcmask 1040384  }
  0x13   :  { %308 = vmatpush1.bf16.msra.mxu1 %v2880_v25  ;;  %266 = vmatprep.subr.bf16.mxu0 %v2881_v26  ;;  %v116_v2 = vrot.slane %v3261_v62, %v3211_v40  ;;  %v86_v26 = vld [vmem:[%s3866_s8 + $0x20] sm:$0xff] }
  0x14   :  { %309 = vmatprep.subr.bf16.mxu1 %v2884_v28  ;;  %v132_v28 = vrot.slane %v86_v26, %v3211_v40 }
  0x16   :  { %267 = vmatpush1.bf16.msra.mxu0 %v2883_v27  ;;  %v87_v27 = vld [vmem:[%s3866_s8 + $0x28] sm:$0xff] }
  0x17   :  { %310 = vmatpush1.bf16.msra.mxu1 %v2886_v29  ;;  %346 = vmatprep.subr.bf16.mxu0 %v2889_v30  ;;  %v136_v30 = vrot.slane %v87_v27, %v3211_v40 }
  0x18   :  { %2643 = vmatprep.subr.bf16.mxu1 %v3087_v61 }
  0x90   :  { %v43_v4 = vpop.xlane.xlu0 %42 }
  0x91   :  { %v48_v5 = vmul.f32 0.015625, %v43_v4 }
  0x93   :  { %v50_v6 = vsub.f32 %v38_v0, %v48_v5  ;;  %v83_v0 = vld [vmem:[%s3866_s8 + $0x8] sm:$0xff] }
  0x94   :  { %v46_v7 = vpop.xlane.xlu0 %45 }
  0x95   :  { %v49_v8 = vmul.f32 0.015625, %v46_v7  ;;  %v52_v9 = vmul.f32 %v50_v6, %v50_v6 }
  0x97   :  { %v51_v10 = vsub.f32 %v39_v1, %v49_v8  ;;  %v54_v11 = vsel %vm40_vm0, %v52_v9, 0.0  ;;  %v85_v1 = vld [vmem:[%s3866_s8 + $0x18] sm:$0xff] }
  0x98   :  { %55 = vadd.xlane.f32.xlu1 %v54_v11  ;;  %v128_v7 = vrot.slane %v85_v1, %v3211_v40 }
  0x99   :  { %v53_v12 = vmul.f32 %v51_v10, %v51_v10 }
  0x9b   :  { %v57_v13 = vsel %vm40_vm0, %v53_v12, 0.0 }
  0x9c   :  { %58 = vadd.xlane.f32.xlu1 %v57_v13 }
 0x125   :  { %v56_v32 = vpop.xlane.xlu1 %55 }
 0x126   :  { %v60_v33 = vmul.f32 0.015625, %v56_v32 }
 0x128   :  { %v62_v34 = vadd.f32 1e-12, %v60_v33 }
 0x129   :  { %v59_v35 = vpop.xlane.xlu1 %58 }
 0x12a   :  { %2999 = vrsqrt.f32 %v62_v34  ;;  %v61_v37 = vmul.f32 0.015625, %v59_v35 }
 0x12c   :  { %v63_v38 = vadd.f32 1e-12, %v61_v37 }
 0x12e   :  { %3001 = vrsqrt.f32 %v63_v38 }
 0x134   :  { %v3000_v42 = vpop.eup %2999 }
 0x135   :  { %v66_v43 = vmul.f32 %v3000_v42, %v50_v6  ;;  %v120_v6 = vrot.slane %v83_v0, %v3211_v40 }
 0x137   :  { %v72_v48 = vmul.f32 %v71_v44, %v66_v43  ;;  %v3301_v43 = vld [vmem:[%s3859_s1] sm:$0xff] }
 0x138   :  { %v3002_v46 = vpop.eup %3001 }
 0x139   :  { %v67_v47 = vmul.f32 %v3002_v46, %v51_v10  ;;  %v3221_v51 = vadd.f32 %v77_v49, %v72_v48  ;;  %v3306_v46 = vld [vmem:[%s3859_s1 + $0x8] sm:$0xff] }
 0x13b   :  { %v73_v50 = vmul.f32 %v71_v44, %v67_v47 }
 0x13d   :  { %v3223_v52 = vadd.f32 %v77_v49, %v73_v50 }
 0x13f   :  { %v112_v54 = vpack.c.bf16 %v3223_v52, %v3221_v51 }
 0x141   :  { %2365 = vmatmul.mubr.msk.bf16.vlgmr.msra.gmra.mrb[0].mxu0 %vm40_vm0, %v112_v54  ;;  %2366 = vmatmul.mubr.msk.bf16.vlgmr.msra.gmra.mrb[0].mxu1 %vm40_vm0, %v112_v54 }
 0x142   :  { %347 = vmatpush1.bf16.msra.mxu0 %v2887_v53  ;;  %378 = vmatprep.mubr.bf16.mxu0 %v3086_v31 }
 0x143   :  { %348 = vmatprep.subr.bf16.mxu0 %v2892_v55  ;;  %2645 = vmatprep.mubr.msk.bf16.mxu1 %vm3088_vm1, %v3087_v61 }
 0x146   :  { %349 = vmatpush1.bf16.msra.mxu0 %v2890_v56 }
 0x147   :  { %350 = vmatprep.subr.bf16.mxu0 %v2895_v57 }
 0x14a   :  { %351 = vmatpush1.bf16.msra.mxu0 %v2893_v58 }
 0x14b   :  { %352 = vmatprep.subr.bf16.mxu0 %v2898_v59 }
 0x14e   :  { %353 = vmatpush1.bf16.msra.mxu0 %v2896_v60 }
 0x14f   :  { %2667 = vmatprep.subr.bf16.mxu0 %v3087_v61 }
 0x151   :  { %2367 = vmatmul.mubr.msk.bf16.vlgmr.msra.gmra.mrb[4].mxu0 %vm40_vm0, %v112_v54 }
 0x152   :  { %2683 = vmatprep.mubr.msk.bf16.mxu0 %vm3088_vm1, %v3087_v61 }
 0x214   :  { %v294_v4 = vpop.f32.mrb[0].mxu0  ;;  %v337_v5 = vpop.f32.mrb[0].mxu1 }
 0x215   :  { %v296_v8 = vpop.f32.mrb[1].mxu0  ;;  %v339_v9 = vpop.f32.mrb[1].mxu1  ;;  %v295_v12 = vadd.f32 %v294_v4, %v116_v2  ;;  %v338_v13 = vadd.f32 %v337_v5, %v124_v3 }
 0x216   :  { %v298_v10 = vpop.f32.mrb[2].mxu0  ;;  %v341_v11 = vpop.f32.mrb[2].mxu1  ;;  %v3277_v18 = vadd.f32 %v296_v8, %v120_v6  ;;  %v3279_v19 = vadd.f32 %v339_v9, %v128_v7 }
 0x217   :  { %v299_v14 = vadd.f32 %v298_v10, %v116_v2  ;;  %v342_v15 = vadd.f32 %v341_v11, %v124_v3  ;;  %v300_v16 = vpop.f32.mrb[3].mxu0  ;;  %v343_v17 = vpop.f32.mrb[3].mxu1 }
 0x218   :  { %v3281_v20 = vadd.f32 %v300_v16, %v120_v6  ;;  %v344_v21 = vadd.f32 %v343_v17, %v128_v7 }
 0x219   :  { %v421_v22 = vpack.c.bf16 %v299_v14, %v295_v12  ;;  %v422_v23 = vpack.c.bf16 %v342_v15, %v338_v13 }
 0x21a   :  { %v534_v24 = vpack.c.bf16 %v3281_v20, %v3277_v18  ;;  %v535_v25 = vpack.c.bf16 %v344_v21, %v3279_v19 }
 0x21b   :  { %2644 = vmatpush3.bf16.xpose.msra.mxu1 %v422_v23 }
 0x21c   :  { %2649 = vmatprep.subr.bf16.mxu1 %v3087_v61 }
 0x222   :  { %2646 = vmatmul.mubr.bf16.vlgmr.msra.gmra.mrb[4].mxu1 %v421_v22 }
 0x223   :  { %2651 = vmatprep.mubr.msk.bf16.mxu1 %vm3088_vm1, %v3087_v61 }
 0x224   :  { %v380_v29 = vpop.f32.mrb[4].mxu0 }
 0x225   :  { %v382_v32 = vpop.f32.mrb[5].mxu0  ;;  %v381_v34 = vadd.f32 %v380_v29, %v132_v28 }
 0x226   :  { %v384_v33 = vpop.f32.mrb[6].mxu0  ;;  %v383_v37 = vadd.f32 %v382_v32, %v136_v30 }
 0x227   :  { %v385_v35 = vadd.f32 %v384_v33, %v132_v28  ;;  %v386_v36 = vpop.f32.mrb[7].mxu0 }
 0x228   :  { %v387_v38 = vadd.f32 %v386_v36, %v136_v30  ;;  %v2908_v36 = vld [vmem:[%s3861_s3 + $0x48] sm:$0xff]  }
 0x229   :  { %v487_v41 = vpack.c.bf16 %v385_v35, %v381_v34  ;;  %v2907_v35 = vld [vmem:[%s3861_s3 + $0x40] sm:$0xff]  }
 0x22a   :  { %v599_v42 = vpack.c.bf16 %v387_v38, %v383_v37  ;;  %2668 = vmatpush3.bf16.msra.mxu0 %v2907_v35  ;;  %v2909_v37 = vld [vmem:[%s3861_s3 + $0x50] sm:$0xff]   ;;  %v2910_v38 = vld [vmem:[%s3861_s3 + $0x58] sm:$0xff]   ;;  %v2916_v35 = vld [vmem:[%s3862_s4 + $0x8] sm:$0xff]  }
 0x22b   :  { %2650 = vmatpush3.bf16.msra.mxu1 %v487_v41  ;;  %2669 = vmatprep.subr.bf16.mxu0 %v3087_v61  ;;  %v2911_v41 = vld [vmem:[%s3861_s3 + $0x60] sm:$0xff]  }
 0x22c   :  { %2655 = vmatprep.subr.bf16.mxu1 %v3087_v61 }
 0x22e   :  { %2670 = vmatpush3.bf16.msra.mxu0 %v2908_v36  ;;  %v2917_v36 = vld [vmem:[%s3862_s4 + $0x10] sm:$0xff]  }
 0x22f   :  { %2671 = vmatprep.subr.bf16.mxu0 %v3087_v61 }
 0x232   :  { %2672 = vmatpush3.bf16.msra.mxu0 %v2909_v37  ;;  %v2918_v37 = vld [vmem:[%s3862_s4 + $0x18] sm:$0xff]  }
 0x233   :  { %2673 = vmatprep.subr.bf16.mxu0 %v3087_v61 }
 0x236   :  { %2674 = vmatpush3.bf16.msra.mxu0 %v2910_v38 }
 0x237   :  { %2675 = vmatprep.subr.bf16.mxu0 %v3087_v61 }
 0x23a   :  { %2676 = vmatpush3.bf16.msra.mxu0 %v2911_v41 }
 0x23b   :  { %2677 = vmatprep.subr.bf16.mxu0 %v3087_v61 }
 0x2f5   :  { %v457_v44 = vpop.f32.mrb[4].mxu1 }
 0x2f6   :  { %v458_v47 = vadd.f32 %v457_v44, %v3301_v43  ;;  %v2647_v48 = vpop.f32.mrb[5].mxu1  ;;  %v2913_v44 = vld [vmem:[%s3861_s3 + $0x70] sm:$0xff]  }
 0x2f7   :  { %v460_v49 = vpop.f32.mrb[6].mxu1 }
 0x2f8   :  { %v461_v50 = vadd.f32 %v460_v49, %v3306_v46  ;;  %v2648_v53 = vpop.f32.mrb[7].mxu1  ;;  %v465_v54 = vsel %vm464_vm2, %v458_v47, -inf }
 0x2f9   :  { %466 = vmax.xlane.f32.xlu0 %v465_v54 }
 0x2fa   :  { %v468_v55 = vsel %vm464_vm2, %v461_v50, -inf }
 0x2fb   :  { %469 = vmax.xlane.f32.xlu1 %v468_v55  ;;  %v2899_v55 = vld [vmem:[%s3861_s3] sm:$0xff]  }
 0x386   :  { %v467_v56 = vpop.xlane.xlu0 %466 }
 0x387   :  { %v471_v57 = vsub.f32 %v458_v47, %v467_v56 }
 0x388   :  { %v470_v58 = vpop.xlane.xlu1 %469 }
 0x389   :  { %v473_v59 = vmul.f32 1.442695, %v471_v57  ;;  %v472_v60 = vsub.f32 %v461_v50, %v470_v58  ;;  %v2900_v57 = vld [vmem:[%s3861_s3 + $0x8] sm:$0xff]   ;;  %v2901_v58 = vld [vmem:[%s3861_s3 + $0x10] sm:$0xff]  }
 0x38b   :  { %3003 = vpow2.f32 %v473_v59  ;;  %v475_v63 = vmul.f32 1.442695, %v472_v60  ;;  %v2902_v59 = vld [vmem:[%s3861_s3 + $0x18] sm:$0xff]   ;;  %v2903_v60 = vld [vmem:[%s3861_s3 + $0x20] sm:$0xff]  }
 0x38d   :  { %3005 = vpow2.f32 %v475_v63  ;;  %v2904_v63 = vld [vmem:[%s3861_s3 + $0x28] sm:$0xff]  }
 0x395   :  { %v3004_v0 = vpop.eup %3003 }
 0x396   :  { %v477_v1 = vsel %vm464_vm2, %v3004_v0, 0.0 }
 0x397   :  { %v3006_v2 = vpop.eup %3005  ;;  %478 = vadd.xlane.f32.xlu0 %v477_v1  ;;  %v2906_v1 = vld [vmem:[%s3861_s3 + $0x38] sm:$0xff]  }
 0x398   :  { %v480_v3 = vsel %vm464_vm2, %v3006_v2, 0.0 }
 0x399   :  { %481 = vadd.xlane.f32.xlu1 %v480_v3 }
 0x424   :  { %v479_v4 = vpop.xlane.xlu0 %478 }
 0x425   :  { %3007 = vrcp.f32 %v479_v4 }
 0x426   :  { %v482_v5 = vpop.xlane.xlu1 %481 }
 0x427   :  { %3009 = vrcp.f32 %v482_v5 }
 0x42f   :  { %v3008_v6 = vpop.eup %3007 }
 0x430   :  { %v485_v8 = vmul.f32 %v3008_v6, %v3004_v0  ;;  %v2905_v0 = vld [vmem:[%s3861_s3 + $0x30] sm:$0xff]  }
 0x431   :  { %v3010_v7 = vpop.eup %3009 }
 0x432   :  { %v486_v9 = vmul.f32 %v3010_v7, %v3006_v2  ;;  %v2914_v2 = vld [vmem:[%s3861_s3 + $0x78] sm:$0xff]  }
 0x434   :  { %v488_v10 = vpack.c.bf16 %v486_v9, %v485_v8 }
 0x436   :  { %2652 = vmatmul.mubr.msk.bf16.vlgmr.msra.gmra.mrb[8].mxu1 %vm464_vm2, %v488_v10 }
 0x437   :  { %2656 = vmatpush3.bf16.xpose.msra.mxu1 %v535_v25  ;;  %2657 = vmatprep.mubr.msk.bf16.mxu1 %vm3088_vm1, %v3087_v61 }
 0x438   :  { %2661 = vmatprep.subr.bf16.mxu1 %v3087_v61 }
 0x43e   :  { %2658 = vmatmul.mubr.bf16.vlgmr.msra.gmra.mrb[12].mxu1 %v534_v24 }
 0x43f   :  { %2662 = vmatpush3.bf16.msra.mxu1 %v599_v42  ;;  %2663 = vmatprep.mubr.msk.bf16.mxu1 %vm3088_vm1, %v3087_v61  ;;  %v2912_v42 = vld [vmem:[%s3861_s3 + $0x68] sm:$0xff]  }
 0x440   :  { %2687 = vmatprep.subr.bf16.mxu1 %v3087_v61  ;;  %2678 = vmatpush3.bf16.msra.mxu0 %v2912_v42 }
 0x441   :  { %2679 = vmatprep.subr.bf16.mxu0 %v3087_v61 }
 0x444   :  { %2680 = vmatpush3.bf16.msra.mxu0 %v2913_v44 }
 0x445   :  { %2681 = vmatprep.subr.bf16.mxu0 %v3087_v61 }
 0x448   :  { %2682 = vmatpush3.bf16.msra.mxu0 %v2914_v2  ;;  %v2919_v2 = vld [vmem:[%s3863_s5] sm:$0xff]  }
 0x449   :  { %2707 = vmatprep.subr.bf16.mxu0 %v3087_v61 }
 0x509   :  { %v3321_v11 = vpop.f32.mrb[8].mxu1 }
 0x50a   :  { %v2653_v12 = vpop.f32.mrb[9].mxu1 }
 0x50b   :  { %v3323_v13 = vpop.f32.mrb[10].mxu1  ;;  %v827_v12 = vrot.slane %v3261_v62, %v3218_v45 }
 0x50c   :  { %v533_v14 = vpack.c.bf16 %v3323_v13, %v3321_v11  ;;  %v2654_v15 = vpop.f32.mrb[11].mxu1 }
 0x511   :  { %v570_v16 = vpop.f32.mrb[12].mxu1 }
 0x512   :  { %v571_v17 = vadd.f32 %v570_v16, %v3301_v43  ;;  %v2659_v18 = vpop.f32.mrb[13].mxu1 }
 0x513   :  { %v573_v19 = vpop.f32.mrb[14].mxu1 }
 0x514   :  { %v574_v20 = vadd.f32 %v573_v19, %v3306_v46  ;;  %v2660_v21 = vpop.f32.mrb[15].mxu1  ;;  %v577_v22 = vsel %vm464_vm2, %v571_v17, -inf }
 0x515   :  { %578 = vmax.xlane.f32.xlu0 %v577_v22 }
 0x516   :  { %v580_v23 = vsel %vm464_vm2, %v574_v20, -inf }
 0x517   :  { %581 = vmax.xlane.f32.xlu1 %v580_v23 }
 0x5a2   :  { %v579_v24 = vpop.xlane.xlu0 %578 }
 0x5a3   :  { %v583_v25 = vsub.f32 %v571_v17, %v579_v24 }
 0x5a4   :  { %v582_v26 = vpop.xlane.xlu1 %581 }
 0x5a5   :  { %v585_v27 = vmul.f32 1.442695, %v583_v25  ;;  %v584_v28 = vsub.f32 %v574_v20, %v582_v26 }
 0x5a7   :  { %3011 = vpow2.f32 %v585_v27  ;;  %v587_v29 = vmul.f32 1.442695, %v584_v28 }
 0x5a9   :  { %3013 = vpow2.f32 %v587_v29 }
 0x5b1   :  { %v3012_v30 = vpop.eup %3011 }
 0x5b2   :  { %v589_v32 = vsel %vm464_vm2, %v3012_v30, 0.0 }
 0x5b3   :  { %v3014_v33 = vpop.eup %3013  ;;  %590 = vadd.xlane.f32.xlu0 %v589_v32 }
 0x5b4   :  { %v592_v34 = vsel %vm464_vm2, %v3014_v33, 0.0 }
 0x5b5   :  { %593 = vadd.xlane.f32.xlu1 %v592_v34 }
 0x640   :  { %v591_v47 = vpop.xlane.xlu0 %590 }
 0x641   :  { %3015 = vrcp.f32 %v591_v47 }
 0x642   :  { %v594_v48 = vpop.xlane.xlu1 %593 }
 0x643   :  { %3017 = vrcp.f32 %v594_v48 }
 0x64b   :  { %v3016_v49 = vpop.eup %3015 }
 0x64c   :  { %v597_v53 = vmul.f32 %v3016_v49, %v3012_v30  ;;  %v3431_v49 = vsub.s32 2, %v3208_v39 }
 0x64d   :  { %v3018_v50 = vpop.eup %3017 }
 0x64e   :  { %v598_v54 = vmul.f32 %v3018_v50, %v3014_v33  ;;  %v861_v50 = vrot.slane %v3261_v62, %v3431_v49 }
 0x650   :  { %v600_v56 = vpack.c.bf16 %v598_v54, %v597_v53  ;;  %v3436_v53 = vsub.s32 3, %v3208_v39 }
 0x652   :  { %2664 = vmatmul.mubr.msk.bf16.vlgmr.msra.gmra.mrb[16].mxu1 %vm464_vm2, %v600_v56 }
 0x653   :  { %2688 = vmatpush3.bf16.msra.mxu1 %v2899_v55  ;;  %2703 = vmatprep.mubr.msk.bf16.mxu1 %vm3088_vm1, %v3087_v61 }
 0x654   :  { %2689 = vmatprep.subr.bf16.mxu1 %v3087_v61 }
 0x657   :  { %2690 = vmatpush3.bf16.msra.mxu1 %v2900_v57 }
 0x658   :  { %2691 = vmatprep.subr.bf16.mxu1 %v3087_v61 }
 0x65b   :  { %2692 = vmatpush3.bf16.msra.mxu1 %v2901_v58 }
 0x65c   :  { %2693 = vmatprep.subr.bf16.mxu1 %v3087_v61 }
 0x65f   :  { %2694 = vmatpush3.bf16.msra.mxu1 %v2902_v59  ;;  %v867_v59 = vrot.slane %v3261_v62, %v3436_v53 }
 0x660   :  { %2695 = vmatprep.subr.bf16.mxu1 %v3087_v61 }
 0x663   :  { %2696 = vmatpush3.bf16.msra.mxu1 %v2903_v60 }
 0x664   :  { %2697 = vmatprep.subr.bf16.mxu1 %v3087_v61 }
 0x667   :  { %2698 = vmatpush3.bf16.msra.mxu1 %v2904_v63 }
 0x668   :  { %2699 = vmatprep.subr.bf16.mxu1 %v3087_v61 }
 0x66b   :  { %2700 = vmatpush3.bf16.msra.mxu1 %v2905_v0 }
 0x66c   :  { %2701 = vmatprep.subr.bf16.mxu1 %v3087_v61 }
 0x66f   :  { %2702 = vmatpush3.bf16.msra.mxu1 %v2906_v1 }
 0x670   :  { %2719 = vmatprep.subr.bf16.mxu1 %v3087_v61 }
 0x672   :  { %2704 = vmatmul.mubr.bf16.vlgmr.msra.gmra.mrb[20].mxu1 %v533_v14 }
 0x673   :  { %2735 = vmatprep.mubr.msk.bf16.mxu1 %vm3088_vm1, %v3087_v61  ;;  %2720 = vmatpush3.bf16.msra.mxu1 %v2919_v2 }
 0x674   :  { %2721 = vmatprep.subr.bf16.mxu1 %v3087_v61 }
 0x725   :  { %v638_v3 = vpop.f32.mrb[16].mxu1 }
 0x726   :  { %v2665_v4 = vpop.f32.mrb[17].mxu1 }
 0x727   :  { %v641_v5 = vpop.f32.mrb[18].mxu1  ;;  %v2921_v4 = vld [vmem:[%s3863_s5 + $0x10] sm:$0xff]  }
 0x728   :  { %v645_v6 = vpack.c.bf16 %v641_v5, %v638_v3  ;;  %v2666_v7 = vpop.f32.mrb[19].mxu1  ;;  %v2920_v3 = vld [vmem:[%s3863_s5 + $0x8] sm:$0xff]   ;;  %v2922_v5 = vld [vmem:[%s3863_s5 + $0x18] sm:$0xff]  }
 0x729   :  { %2722 = vmatpush3.bf16.msra.mxu1 %v2920_v3  ;;  %v2924_v7 = vld [vmem:[%s3863_s5 + $0x28] sm:$0xff]  }
 0x72a   :  { %2684 = vmatmul.mubr.bf16.vlgmr.msra.gmra.mrb[8].mxu0 %v645_v6  ;;  %2723 = vmatprep.subr.bf16.mxu1 %v3087_v61  ;;  %v2923_v6 = vld [vmem:[%s3863_s5 + $0x20] sm:$0xff]  }
 0x72b   :  { %2715 = vmatprep.mubr.msk.bf16.mxu0 %vm3088_vm1, %v3087_v61 }
 0x72d   :  { %2724 = vmatpush3.bf16.msra.mxu1 %v2921_v4 }
 0x72e   :  { %2725 = vmatprep.subr.bf16.mxu1 %v3087_v61 }
 0x731   :  { %2726 = vmatpush3.bf16.msra.mxu1 %v2922_v5 }
 0x732   :  { %2727 = vmatprep.subr.bf16.mxu1 %v3087_v61 }
 0x735   :  { %2728 = vmatpush3.bf16.msra.mxu1 %v2923_v6  ;;  %v2927_v6 = vld [vmem:[%s3860_s2 + $0xc0] ss:$24 sps:$4 sm:$0xff]  }
 0x736   :  { %2729 = vmatprep.subr.bf16.mxu1 %v3087_v61 }
 0x739   :  { %2730 = vmatpush3.bf16.msra.mxu1 %v2924_v7  ;;  %v2932_v7 = vld [vmem:[%s3860_s2 + $0xd4] ss:$24 sps:$4 sm:$0xff]  }
 0x73a   :  { %2731 = vmatprep.subr.bf16.mxu1 %v3087_v61 }
 0x745   :  { %v817_v8 = vpop.f32.mrb[20].mxu1 }
 0x746   :  { %v2705_v9 = vpop.f32.mrb[21].mxu1 }
 0x747   :  { %v820_v10 = vpop.f32.mrb[22].mxu1  ;;  %v2926_v9 = vld [vmem:[%s3863_s5 + $0x38] sm:$0xff]  }
 0x748   :  { %v2706_v11 = vpop.f32.mrb[23].mxu1 }
 0x7fd   :  { %v728_v13 = vpop.f32.mrb[8].mxu0 }
 0x7fe   :  { %v818_v14 = vadd.f32 %v817_v8, %v728_v13  ;;  %v2685_v15 = vpop.f32.mrb[9].mxu0  ;;  %v2925_v8 = vld [vmem:[%s3863_s5 + $0x30] sm:$0xff]  }
 0x7ff   :  { %v731_v16 = vpop.f32.mrb[10].mxu0  ;;  %2732 = vmatpush3.bf16.msra.mxu1 %v2925_v8  ;;  %v2930_v8 = vld [vmem:[%s3860_s2 + $0xd0] ss:$24 sps:$4 sm:$0xff]  }
 0x800   :  { %v828_v17 = vadd.f32 %v827_v12, %v818_v14  ;;  %v821_v18 = vadd.f32 %v820_v10, %v731_v16  ;;  %v2686_v19 = vpop.f32.mrb[11].mxu0  ;;  %2733 = vmatprep.subr.bf16.mxu1 %v3087_v61  ;;  %v881_v10 = vsub.s32 4, %v3208_v39 }
 0x802   :  { %v829_v20 = vadd.f32 %v827_v12, %v821_v18  ;;  %v830_v21 = vadd.f32 %v828_v17, %v3221_v51  ;;  %v882_v11 = vrot.slane %v3261_v62, %v881_v10 }
 0x803   :  { %2734 = vmatpush3.bf16.msra.mxu1 %v2926_v9  ;;  %v2935_v9 = vld [vmem:[%s3860_s2 + $0xf4] ss:$24 sps:$4 sm:$0xff]  }
 0x804   :  { %v832_v22 = vsel %vm40_vm0, %v830_v21, 0.0  ;;  %v831_v23 = vadd.f32 %v829_v20, %v3223_v52  ;;  %v2915_v52 = vld [vmem:[%s3862_s4] sm:$0xff]   ;;  %1385 = vmatprep.subr.bf16.mxu1 %v2932_v7 }
 0x805   :  { %833 = vadd.xlane.f32.xlu0 %v832_v22  ;;  %2708 = vmatpush3.bf16.msra.mxu0 %v2915_v52 }
 0x806   :  { %v835_v24 = vsel %vm40_vm0, %v831_v23, 0.0  ;;  %2709 = vmatprep.subr.bf16.mxu0 %v3087_v61 }
 0x807   :  { %836 = vadd.xlane.f32.xlu1 %v835_v24 }
 0x809   :  { %2710 = vmatpush3.bf16.msra.mxu0 %v2916_v35 }
 0x80a   :  { %2711 = vmatprep.subr.bf16.mxu0 %v3087_v61 }
 0x80d   :  { %2712 = vmatpush3.bf16.msra.mxu0 %v2917_v36  ;;  %v988_v36 = vsub.s32 5, %v3208_v39 }
 0x80e   :  { %2713 = vmatprep.subr.bf16.mxu0 %v3087_v61 }
 0x811   :  { %2714 = vmatpush3.bf16.msra.mxu0 %v2918_v37  ;;  %v989_v37 = vrot.slane %v3261_v62, %v988_v36 }
 0x892   :  { %v834_v25 = vpop.xlane.xlu0 %833 }
 0x893   :  { %v838_v26 = vmul.f32 0.015625, %v834_v25 }
 0x894   :  { %v837_v27 = vpop.xlane.xlu1 %836 }
 0x895   :  { %v840_v28 = vsub.f32 %v830_v21, %v838_v26  ;;  %v839_v29 = vmul.f32 0.015625, %v837_v27 }
 0x897   :  { %v841_v30 = vsub.f32 %v831_v23, %v839_v29  ;;  %v842_v32 = vmul.f32 %v840_v28, %v840_v28 }
 0x899   :  { %v844_v33 = vsel %vm40_vm0, %v842_v32, 0.0  ;;  %v843_v34 = vmul.f32 %v841_v30, %v841_v30 }
 0x89a   :  { %845 = vadd.xlane.f32.xlu0 %v844_v33 }
 0x89b   :  { %v847_v51 = vsel %vm40_vm0, %v843_v34, 0.0 }
 0x89c   :  { %848 = vadd.xlane.f32.xlu1 %v847_v51 }
 0x927   :  { %v846_v38 = vpop.xlane.xlu0 %845 }
 0x928   :  { %v850_v41 = vmul.f32 0.015625, %v846_v38 }
 0x929   :  { %v849_v42 = vpop.xlane.xlu1 %848 }
 0x92a   :  { %v852_v44 = vadd.f32 1e-12, %v850_v41  ;;  %v851_v47 = vmul.f32 0.015625, %v849_v42 }
 0x92c   :  { %3019 = vrsqrt.f32 %v852_v44  ;;  %v853_v48 = vadd.f32 1e-12, %v851_v47 }
 0x92e   :  { %3021 = vrsqrt.f32 %v853_v48 }
 0x936   :  { %v3020_v54 = vpop.eup %3019 }
 0x937   :  { %v856_v55 = vmul.f32 %v3020_v54, %v840_v28 }
 0x938   :  { %v3022_v56 = vpop.eup %3021 }
 0x939   :  { %v862_v57 = vmul.f32 %v861_v50, %v856_v55  ;;  %v857_v58 = vmul.f32 %v3022_v56, %v841_v30 }
 0x93b   :  { %v863_v60 = vmul.f32 %v861_v50, %v857_v58  ;;  %v3440_v63 = vadd.f32 %v867_v59, %v862_v57 }
 0x93d   :  { %v3442_v0 = vadd.f32 %v867_v59, %v863_v60 }
 0x93f   :  { %v878_v1 = vpack.c.bf16 %v3442_v0, %v3440_v63 }
 0x941   :  { %2716 = vmatmul.mubr.msk.bf16.vlgmr.msra.gmra.mrb[12].mxu0 %vm40_vm0, %v878_v1 }
 0x942   :  { %1331 = vmatprep.mubr.bf16.mxu0 %v3086_v31 }
 0xa14   :  { %v944_v12 = vpop.f32.mrb[12].mxu0 }
 0xa15   :  { %v945_v13 = vadd.f32 %v944_v12, %v882_v11  ;;  %v2717_v14 = vpop.f32.mrb[13].mxu0  ;;  %v2938_v12 = vld [vmem:[%s3860_s2 + $0x104] ss:$24 sps:$4 sm:$0xff]  }
 0xa16   :  { %v947_v15 = vpop.f32.mrb[14].mxu0  ;;  %v2941_v14 = vld [vmem:[%s3860_s2 + $0x124] ss:$24 sps:$4 sm:$0xff]  }
 0xa17   :  { %v951_v16 = vmul.f32 %v945_v13, %v945_v13  ;;  %v948_v17 = vadd.f32 %v947_v15, %v882_v11  ;;  %v2718_v18 = vpop.f32.mrb[15].mxu0  ;;  %v2933_v11 = vld [vmem:[%s3860_s2 + $0xf0] ss:$24 sps:$4 sm:$0xff]   ;;  %v2939_v15 = vld [vmem:[%s3860_s2 + $0x120] ss:$24 sps:$4 sm:$0xff]  }
 0xa18   :  { %v2945_v18 = vld [vmem:[%s3860_s2 + $0x150] ss:$24 sps:$4 sm:$0xff]  }
 0xa19   :  { %v953_v19 = vmul.f32 %v951_v16, %v945_v13  ;;  %v952_v20 = vmul.f32 %v948_v17, %v948_v17  ;;  %v2944_v16 = vld [vmem:[%s3860_s2 + $0x134] ss:$24 sps:$4 sm:$0xff]  }
 0xa1b   :  { %v955_v21 = vmul.f32 0.044715, %v953_v19  ;;  %v954_v22 = vmul.f32 %v952_v20, %v948_v17  ;;  %v2947_v19 = vld [vmem:[%s3860_s2 + $0x154] ss:$24 sps:$4 sm:$0xff]   ;;  %v2948_v20 = vld [vmem:[%s3860_s2 + $0x160] ss:$24 sps:$4 sm:$0xff]  }
 0xa1d   :  { %v957_v23 = vadd.f32 %v955_v21, %v945_v13  ;;  %v956_v24 = vmul.f32 0.044715, %v954_v22  ;;  %v2950_v21 = vld [vmem:[%s3860_s2 + $0x164] ss:$24 sps:$4 sm:$0xff]  }
 0xa1e   :  { %v2953_v22 = vld [vmem:[%s3860_s2 + $0xcc] ss:$24 sps:$4 sm:$0xff]  }
 0xa1f   :  { %v959_v25 = vmul.f32 0.7978846, %v957_v23  ;;  %v958_v26 = vadd.f32 %v956_v24, %v948_v17 }
 0xa21   :  { %3023 = vtanh.f32 %v959_v25  ;;  %v960_v27 = vmul.f32 0.7978846, %v958_v26 }
 0xa23   :  { %3025 = vtanh.f32 %v960_v27 }
 0xa2b   :  { %v3024_v28 = vpop.eup %3023 }
 0xa2c   :  { %v963_v29 = vadd.f32 1.0, %v3024_v28 }
 0xa2d   :  { %v3026_v30 = vpop.eup %3025 }
 0xa2e   :  { %v965_v32 = vmul.f32 0.5, %v963_v29  ;;  %v964_v33 = vadd.f32 1.0, %v3026_v30  ;;  %v1109_v29 = vsub.s32 6, %v3208_v39 }
 0xa30   :  { %v966_v34 = vmul.f32 0.5, %v964_v33  ;;  %v967_v51 = vmul.f32 %v965_v32, %v945_v13  ;;  %v2936_v13 = vld [vmem:[%s3860_s2 + $0x100] ss:$24 sps:$4 sm:$0xff]   ;;  %v1110_v30 = vrot.slane %v3261_v62, %v1109_v29  ;;  %v1115_v32 = vsub.s32 7, %v3208_v39  ;;  %v2996_v39 = vld [vmem:[%s3865_s7 + $0x8] sm:$0xff]  }
 0xa32   :  { %v968_v52 = vmul.f32 %v966_v34, %v948_v17  ;;  %v2942_v17 = vld [vmem:[%s3860_s2 + $0x130] ss:$24 sps:$4 sm:$0xff]  }
 0xa34   :  { %v985_v35 = vpack.c.bf16 %v968_v52, %v967_v51 }
 0xa36   :  { %2736 = vmatmul.mubr.bf16.vlgmr.msra.gmra.mrb[24].mxu1 %v985_v35 }
 0xa37   :  { %1417 = vmatprep.mubr.bf16.mxu1 %v3086_v31  ;;  %1386 = vmatpush1.bf16.msra.mxu1 %v2930_v8 }
 0xa38   :  { %1387 = vmatprep.subr.bf16.mxu1 %v2938_v12 }
 0xa3b   :  { %1388 = vmatpush1.bf16.msra.mxu1 %v2936_v13 }
 0xa3c   :  { %1389 = vmatprep.subr.bf16.mxu1 %v2944_v16 }
 0xa3f   :  { %1390 = vmatpush1.bf16.msra.mxu1 %v2942_v17 }
 0xa40   :  { %1391 = vmatprep.subr.bf16.mxu1 %v2950_v21 }
 0xa43   :  { %1392 = vmatpush1.bf16.msra.mxu1 %v2948_v20 }
 0xa44   :  { %2745 = vmatprep.subr.bf16.mxu1 %v3087_v61 }
 0xb09   :  { %v1072_v38 = vpop.f32.mrb[24].mxu1 }
 0xb0a   :  { %v1073_v41 = vadd.f32 %v1072_v38, %v989_v37  ;;  %v2737_v42 = vpop.f32.mrb[25].mxu1 }
 0xb0b   :  { %v1075_v44 = vpop.f32.mrb[26].mxu1 }
 0xb0c   :  { %v1076_v47 = vadd.f32 %v1075_v44, %v989_v37  ;;  %v2738_v48 = vpop.f32.mrb[27].mxu1  ;;  %v1079_v50 = vadd.f32 %v1073_v41, %v3440_v63  ;;  %v1116_v37 = vrot.slane %v3261_v62, %v1115_v32  ;;  %v2951_v44 = vld [vmem:[%s3860_s2 + $0xc8] ss:$24 sps:$4 sm:$0xff]   ;;  %v2954_v62 = vld [vmem:[%s3860_s2 + $0xf8] ss:$24 sps:$4 sm:$0xff]  }
 0xb0d   :  { %v2956_v48 = vld [vmem:[%s3860_s2 + $0xfc] ss:$24 sps:$4 sm:$0xff]  }
 0xb0e   :  { %v1081_v54 = vsel %vm40_vm0, %v1079_v50, 0.0  ;;  %v1080_v55 = vadd.f32 %v1076_v47, %v3442_v0  ;;  %v2929_v0 = vld [vmem:[%s3860_s2 + $0xc4] ss:$24 sps:$4 sm:$0xff]  }
 0xb0f   :  { %1082 = vadd.xlane.f32.xlu0 %v1081_v54  ;;  %1299 = vmatprep.subr.bf16.mxu0 %v2929_v0  ;;  %v2957_v54 = vld [vmem:[%s3860_s2 + $0x128] ss:$24 sps:$4 sm:$0xff]  }
 0xb10   :  { %v1084_v56 = vsel %vm40_vm0, %v1080_v55, 0.0  ;;  %1300 = vmatpush1.bf16.msra.mxu0 %v2927_v6 }
 0xb11   :  { %1085 = vadd.xlane.f32.xlu1 %v1084_v56  ;;  %1301 = vmatprep.subr.bf16.mxu0 %v2935_v9  ;;  %v3593_v56 = vld [vmem:[%s3866_s8 + $0x30] sm:$0xff] }
 0xb14   :  { %1302 = vmatpush1.bf16.msra.mxu0 %v2933_v11 }
 0xb15   :  { %1303 = vmatprep.subr.bf16.mxu0 %v2941_v14 }
 0xb18   :  { %1304 = vmatpush1.bf16.msra.mxu0 %v2939_v15 }
 0xb19   :  { %1305 = vmatprep.subr.bf16.mxu0 %v2947_v19 }
 0xb1c   :  { %1306 = vmatpush1.bf16.msra.mxu0 %v2945_v18 }
 0xb1d   :  { %1342 = vmatprep.subr.bf16.mxu0 %v2953_v22 }
 0xb9c   :  { %v1083_v57 = vpop.xlane.xlu0 %1082 }
 0xb9d   :  { %v1087_v58 = vmul.f32 0.015625, %v1083_v57  ;;  %v2403_v57 = vld [vmem:[%s3866_s8 + $0x50] sm:$0xff] }
 0xb9e   :  { %v1086_v59 = vpop.xlane.xlu1 %1085 }
 0xb9f   :  { %v1089_v60 = vsub.f32 %v1079_v50, %v1087_v58  ;;  %v1088_v1 = vmul.f32 0.015625, %v1086_v59  ;;  %v2959_v50 = vld [vmem:[%s3860_s2 + $0x12c] ss:$24 sps:$4 sm:$0xff]   ;;  %v2400_v58 = vld [vmem:[%s3866_s8 + $0x38] sm:$0xff] }
 0xba0   :  { %v2404_v59 = vld [vmem:[%s3866_s8 + $0x58] sm:$0xff] }
 0xba1   :  { %v1090_v2 = vsub.f32 %v1080_v55, %v1088_v1  ;;  %v1091_v3 = vmul.f32 %v1089_v60, %v1089_v60  ;;  %v2962_v55 = vld [vmem:[%s3860_s2 + $0x15c] ss:$24 sps:$4 sm:$0xff]   ;;  %v1171_v1 = vrot.slane %v2403_v57, %v3211_v40 }
 0xba3   :  { %v1093_v4 = vsel %vm40_vm0, %v1091_v3, 0.0  ;;  %v1092_v5 = vmul.f32 %v1090_v2, %v1090_v2 }
 0xba4   :  { %1094 = vadd.xlane.f32.xlu0 %v1093_v4  ;;  %v1159_v4 = vrot.slane %v2400_v58, %v3211_v40 }
 0xba5   :  { %v1096_v63 = vsel %vm40_vm0, %v1092_v5, 0.0  ;;  %v1175_v5 = vrot.slane %v2404_v59, %v3211_v40 }
 0xba6   :  { %1097 = vadd.xlane.f32.xlu1 %v1096_v63 }
 0xc31   :  { %v1095_v23 = vpop.xlane.xlu0 %1094 }
 0xc32   :  { %v1099_v24 = vmul.f32 0.015625, %v1095_v23  ;;  %v2401_v23 = vld [vmem:[%s3866_s8 + $0x40] sm:$0xff] }
 0xc33   :  { %v1098_v25 = vpop.xlane.xlu1 %1097 }
 0xc34   :  { %v1101_v26 = vadd.f32 1e-12, %v1099_v24  ;;  %v1100_v27 = vmul.f32 0.015625, %v1098_v25  ;;  %v2402_v24 = vld [vmem:[%s3866_s8 + $0x48] sm:$0xff]  ;;  %v1163_v25 = vrot.slane %v2401_v23, %v3211_v40 }
 0xc36   :  { %3027 = vrsqrt.f32 %v1101_v26  ;;  %v1102_v28 = vadd.f32 1e-12, %v1100_v27  ;;  %v1167_v27 = vrot.slane %v2402_v24, %v3211_v40  ;;  %v2965_v24 = vld [vmem:[%s3861_s3 + $0xc0] sm:$0xff]  }
 0xc38   :  { %3029 = vrsqrt.f32 %v1102_v28 }
 0xc40   :  { %v3028_v33 = vpop.eup %3027 }
 0xc41   :  { %v1105_v34 = vmul.f32 %v3028_v33, %v1089_v60  ;;  %v1155_v60 = vrot.slane %v3593_v56, %v3211_v40 }
 0xc42   :  { %v3030_v51 = vpop.eup %3029 }
 0xc43   :  { %v1111_v52 = vmul.f32 %v1110_v30, %v1105_v34  ;;  %v1106_v35 = vmul.f32 %v3030_v51, %v1090_v2 }
 0xc45   :  { %v1112_v38 = vmul.f32 %v1110_v30, %v1106_v35  ;;  %v3554_v41 = vadd.f32 %v1116_v37, %v1111_v52 }
 0xc47   :  { %v3556_v42 = vadd.f32 %v1116_v37, %v1112_v38 }
 0xc49   :  { %v1151_v47 = vpack.c.bf16 %v3556_v42, %v3554_v41 }
 0xc4b   :  { %2453 = vmatmul.mubr.msk.bf16.vlgmr.msra.gmra.mrb[16].mxu0 %vm40_vm0, %v1151_v47  ;;  %2455 = vmatmul.mubr.msk.bf16.vlgmr.msra.gmra.mrb[28].mxu1 %vm40_vm0, %v1151_v47 }
 0xc4c   :  { %1343 = vmatpush1.bf16.msra.mxu0 %v2951_v44  ;;  %1374 = vmatprep.mubr.bf16.mxu0 %v3086_v31  ;;  %v2960_v31 = vld [vmem:[%s3860_s2 + $0x158] ss:$24 sps:$4 sm:$0xff]  }
 0xc4d   :  { %1344 = vmatprep.subr.bf16.mxu0 %v2956_v48  ;;  %2747 = vmatprep.mubr.msk.bf16.mxu1 %vm3088_vm1, %v3087_v61 }
 0xc50   :  { %1345 = vmatpush1.bf16.msra.mxu0 %v2954_v62 }
 0xc51   :  { %1346 = vmatprep.subr.bf16.mxu0 %v2959_v50 }
 0xc54   :  { %1347 = vmatpush1.bf16.msra.mxu0 %v2957_v54 }
 0xc55   :  { %1348 = vmatprep.subr.bf16.mxu0 %v2962_v55 }
 0xc58   :  { %1349 = vmatpush1.bf16.msra.mxu0 %v2960_v31 }
 0xc59   :  { %2739 = vmatprep.subr.bf16.mxu0 %v3087_v61 }
 0xc5b   :  { %2454 = vmatmul.mubr.msk.bf16.vlgmr.msra.gmra.mrb[20].mxu0 %vm40_vm0, %v1151_v47 }
 0xc5c   :  { %2741 = vmatprep.mubr.msk.bf16.mxu0 %vm3088_vm1, %v3087_v61 }
 0xd1e   :  { %v1333_v2 = vpop.f32.mrb[16].mxu0  ;;  %v1419_v3 = vpop.f32.mrb[28].mxu1 }
 0xd1f   :  { %v1335_v63 = vpop.f32.mrb[17].mxu0  ;;  %v1421_v0 = vpop.f32.mrb[29].mxu1  ;;  %v1334_v8 = vadd.f32 %v1333_v2, %v1155_v60  ;;  %v1420_v9 = vadd.f32 %v1419_v3, %v1171_v1 }
 0xd20   :  { %v1337_v6 = vpop.f32.mrb[18].mxu0  ;;  %v1423_v7 = vpop.f32.mrb[30].mxu1  ;;  %v1336_v15 = vadd.f32 %v1335_v63, %v1159_v4  ;;  %v3609_v16 = vadd.f32 %v1421_v0, %v1175_v5 }
 0xd21   :  { %v1338_v11 = vadd.f32 %v1337_v6, %v1155_v60  ;;  %v1424_v12 = vadd.f32 %v1423_v7, %v1171_v1  ;;  %v1339_v13 = vpop.f32.mrb[19].mxu0  ;;  %v1425_v14 = vpop.f32.mrb[31].mxu1 }
 0xd22   :  { %v1340_v17 = vadd.f32 %v1339_v13, %v1159_v4  ;;  %v3611_v18 = vadd.f32 %v1425_v14, %v1175_v5 }
 0xd23   :  { %v1461_v19 = vpack.c.bf16 %v1338_v11, %v1334_v8  ;;  %v1526_v20 = vpack.c.bf16 %v1424_v12, %v1420_v9 }
 0xd24   :  { %v1573_v21 = vpack.c.bf16 %v1340_v17, %v1336_v15  ;;  %v1638_v22 = vpack.c.bf16 %v3611_v18, %v3609_v16  ;;  %v2964_v16 = vld [vmem:[%s3861_s3 + $0x88] sm:$0xff]   ;;  %v2966_v18 = vld [vmem:[%s3861_s3 + $0x90] sm:$0xff]  }
 0xd25   :  { %2746 = vmatpush3.bf16.msra.mxu1 %v1526_v20 }
 0xd26   :  { %2757 = vmatprep.subr.bf16.mxu1 %v3087_v61 }
 0xd2e   :  { %v1376_v26 = vpop.f32.mrb[20].mxu0 }
 0xd2f   :  { %v1378_v28 = vpop.f32.mrb[21].mxu0  ;;  %v1377_v33 = vadd.f32 %v1376_v26, %v1163_v25  ;;  %v2969_v26 = vld [vmem:[%s3861_s3 + $0xd0] sm:$0xff]  }
 0xd30   :  { %v1380_v30 = vpop.f32.mrb[22].mxu0  ;;  %v1379_v52 = vadd.f32 %v1378_v28, %v1167_v27  ;;  %v2973_v28 = vld [vmem:[%s3861_s3 + $0xe0] sm:$0xff]  }
 0xd31   :  { %v1381_v34 = vadd.f32 %v1380_v30, %v1163_v25  ;;  %v1382_v51 = vpop.f32.mrb[23].mxu0  ;;  %v2967_v25 = vld [vmem:[%s3861_s3 + $0xc8] sm:$0xff]  }
 0xd32   :  { %v1383_v35 = vadd.f32 %v1382_v51, %v1167_v27  ;;  %v2971_v27 = vld [vmem:[%s3861_s3 + $0xd8] sm:$0xff]  }
 0xd33   :  { %v1462_v37 = vpack.c.bf16 %v1381_v34, %v1377_v33 }
 0xd34   :  { %v1574_v38 = vpack.c.bf16 %v1383_v35, %v1379_v52 }
 0xd35   :  { %2740 = vmatpush3.bf16.xpose.msra.mxu0 %v1462_v37 }
 0xd36   :  { %2751 = vmatprep.subr.bf16.mxu0 %v3087_v61 }
 0xd3c   :  { %2742 = vmatmul.mubr.bf16.vlgmr.msra.gmra.mrb[24].mxu0 %v1461_v19 }
 0xd3d   :  { %2752 = vmatpush3.bf16.xpose.msra.mxu0 %v1574_v38  ;;  %2753 = vmatprep.mubr.msk.bf16.mxu0 %vm3088_vm1, %v3087_v61 }
 0xd3e   :  { %2763 = vmatprep.subr.bf16.mxu0 %v3087_v61 }
 0xd44   :  { %2754 = vmatmul.mubr.bf16.vlgmr.msra.gmra.mrb[28].mxu0 %v1573_v21 }
 0xd45   :  { %2779 = vmatprep.mubr.msk.bf16.mxu0 %vm3088_vm1, %v3087_v61  ;;  %2764 = vmatpush3.bf16.msra.mxu0 %v2965_v24 }
 0xd46   :  { %2765 = vmatprep.subr.bf16.mxu0 %v3087_v61 }
 0xd49   :  { %2766 = vmatpush3.bf16.msra.mxu0 %v2967_v25 }
 0xd4a   :  { %2767 = vmatprep.subr.bf16.mxu0 %v3087_v61 }
 0xd4d   :  { %2768 = vmatpush3.bf16.msra.mxu0 %v2969_v26 }
 0xd4e   :  { %2769 = vmatprep.subr.bf16.mxu0 %v3087_v61 }
 0xd51   :  { %2770 = vmatpush3.bf16.msra.mxu0 %v2971_v27 }
 0xd52   :  { %2771 = vmatprep.subr.bf16.mxu0 %v3087_v61 }
 0xd55   :  { %2772 = vmatpush3.bf16.msra.mxu0 %v2973_v28 }
 0xd56   :  { %2773 = vmatprep.subr.bf16.mxu0 %v3087_v61 }
 0xe0f   :  { %v1497_v40 = vpop.f32.mrb[24].mxu0 }
 0xe10   :  { %v1498_v44 = vadd.f32 %v1497_v40, %v3301_v43  ;;  %v2743_v47 = vpop.f32.mrb[25].mxu0 }
 0xe11   :  { %v1500_v48 = vpop.f32.mrb[26].mxu0 }
 0xe12   :  { %v1501_v62 = vadd.f32 %v1500_v48, %v3306_v46  ;;  %v2744_v50 = vpop.f32.mrb[27].mxu0  ;;  %v1504_v54 = vsel %vm464_vm2, %v1498_v44, -inf }
 0xe13   :  { %1505 = vmax.xlane.f32.xlu0 %v1504_v54  ;;  %v2963_v50 = vld [vmem:[%s3861_s3 + $0x80] sm:$0xff]  }
 0xe14   :  { %v1507_v55 = vsel %vm464_vm2, %v1501_v62, -inf }
 0xe15   :  { %1508 = vmax.xlane.f32.xlu1 %v1507_v55  ;;  %v2970_v55 = vld [vmem:[%s3861_s3 + $0xa0] sm:$0xff]  }
 0xe17   :  { %v1609_v31 = vpop.f32.mrb[28].mxu0 }
 0xe18   :  { %v1610_v57 = vadd.f32 %v1609_v31, %v3301_v43  ;;  %v2755_v58 = vpop.f32.mrb[29].mxu0  ;;  %v2972_v31 = vld [vmem:[%s3861_s3 + $0xa8] sm:$0xff]  }
 0xe19   :  { %v1612_v59 = vpop.f32.mrb[30].mxu0  ;;  %v2975_v58 = vld [vmem:[%s3861_s3 + $0xe8] sm:$0xff]  }
 0xe1a   :  { %v1613_v60 = vadd.f32 %v1612_v59, %v3306_v46  ;;  %v2756_v1 = vpop.f32.mrb[31].mxu0  ;;  %v1616_v2 = vsel %vm464_vm2, %v1610_v57, -inf  ;;  %v2976_v59 = vld [vmem:[%s3861_s3 + $0xb8] sm:$0xff]   ;;  %2774 = vmatpush3.bf16.msra.mxu0 %v2975_v58 }
 0xe1b   :  { %1617 = vmax.xlane.f32.xlu0 %v1616_v2  ;;  %2775 = vmatprep.subr.bf16.mxu0 %v3087_v61  ;;  %v2978_v1 = vld [vmem:[%s3861_s3 + $0xf8] sm:$0xff]  }
 0xe1c   :  { %v1619_v3 = vsel %vm464_vm2, %v1613_v60, -inf }
 0xe1d   :  { %1620 = vmax.xlane.f32.xlu1 %v1619_v3 }
 0xea0   :  { %v1506_v4 = vpop.xlane.xlu0 %1505 }
 0xea1   :  { %v1510_v5 = vsub.f32 %v1498_v44, %v1506_v4 }
 0xea2   :  { %v1509_v63 = vpop.xlane.xlu1 %1508 }
 0xea3   :  { %v1512_v0 = vmul.f32 1.442695, %v1510_v5  ;;  %v1511_v6 = vsub.f32 %v1501_v62, %v1509_v63 }
 0xea5   :  { %3031 = vpow2.f32 %v1512_v0  ;;  %v1514_v7 = vmul.f32 1.442695, %v1511_v6 }
 0xea7   :  { %3033 = vpow2.f32 %v1514_v7 }
 0xea8   :  { %v1618_v43 = vpop.xlane.xlu0 %1617 }
 0xea9   :  { %v1622_v8 = vsub.f32 %v1610_v57, %v1618_v43  ;;  %v2974_v57 = vld [vmem:[%s3861_s3 + $0xb0] sm:$0xff]  }
 0xeaa   :  { %v1621_v9 = vpop.xlane.xlu1 %1620 }
 0xeab   :  { %v1624_v11 = vmul.f32 1.442695, %v1622_v8  ;;  %v1623_v46 = vsub.f32 %v1613_v60, %v1621_v9  ;;  %v2977_v60 = vld [vmem:[%s3861_s3 + $0xf0] sm:$0xff]  }
 0xeac   :  { %2776 = vmatpush3.bf16.msra.mxu0 %v2977_v60  ;;  %v1906_v60 = vrot.slane %v3593_v56, %v3436_v53 }
 0xead   :  { %3035 = vpow2.f32 %v1624_v11  ;;  %v1626_v12 = vmul.f32 1.442695, %v1623_v46  ;;  %2777 = vmatprep.subr.bf16.mxu0 %v3087_v61 }
 0xeaf   :  { %v3032_v13 = vpop.eup %3031  ;;  %3037 = vpow2.f32 %v1626_v12 }
 0xeb0   :  { %v1516_v14 = vsel %vm464_vm2, %v3032_v13, 0.0  ;;  %2778 = vmatpush3.bf16.msra.mxu0 %v2978_v1 }
 0xeb1   :  { %v3034_v15 = vpop.eup %3033  ;;  %1517 = vadd.xlane.f32.xlu0 %v1516_v14  ;;  %2803 = vmatprep.subr.bf16.mxu0 %v3087_v61 }
 0xeb2   :  { %v1519_v17 = vsel %vm464_vm2, %v3034_v15, 0.0 }
 0xeb3   :  { %1520 = vadd.xlane.f32.xlu1 %v1519_v17 }
 0xeb7   :  { %v3036_v19 = vpop.eup %3035 }
 0xeb8   :  { %v1628_v20 = vsel %vm464_vm2, %v3036_v19, 0.0 }
 0xeb9   :  { %v3038_v21 = vpop.eup %3037  ;;  %1629 = vadd.xlane.f32.xlu0 %v1628_v20 }
 0xeba   :  { %v1631_v23 = vsel %vm464_vm2, %v3038_v21, 0.0 }
 0xebb   :  { %1632 = vadd.xlane.f32.xlu1 %v1631_v23 }
 0xf3e   :  { %v1518_v30 = vpop.xlane.xlu0 %1517 }
 0xf3f   :  { %3039 = vrcp.f32 %v1518_v30 }
 0xf40   :  { %v1521_v33 = vpop.xlane.xlu1 %1520 }
 0xf41   :  { %3041 = vrcp.f32 %v1521_v33 }
 0xf46   :  { %v1630_v34 = vpop.xlane.xlu0 %1629 }
 0xf47   :  { %3043 = vrcp.f32 %v1630_v34 }
 0xf48   :  { %v1633_v51 = vpop.xlane.xlu1 %1632 }
 0xf49   :  { %v3040_v52 = vpop.eup %3039  ;;  %3045 = vrcp.f32 %v1633_v51 }
 0xf4a   :  { %v1524_v37 = vmul.f32 %v3040_v52, %v3032_v13  ;;  %v1866_v13 = vrot.slane %v3593_v56, %v3218_v45 }
 0xf4b   :  { %v3042_v35 = vpop.eup %3041 }
 0xf4c   :  { %v1525_v38 = vmul.f32 %v3042_v35, %v3034_v15 }
 0xf4e   :  { %v1527_v40 = vpack.c.bf16 %v1525_v38, %v1524_v37 }
 0xf50   :  { %2748 = vmatmul.mubr.msk.bf16.vlgmr.msra.gmra.mrb[32].mxu1 %vm464_vm2, %v1527_v40  ;;  %v2980_v40 = vld [vmem:[%s3862_s4 + $0x28] sm:$0xff]  }
 0xf51   :  { %v3044_v44 = vpop.eup %3043  ;;  %2758 = vmatpush3.bf16.msra.mxu1 %v1638_v22  ;;  %2759 = vmatprep.mubr.msk.bf16.mxu1 %vm3088_vm1, %v3087_v61  ;;  %v2968_v22 = vld [vmem:[%s3861_s3 + $0x98] sm:$0xff]  }
 0xf52   :  { %2783 = vmatprep.subr.bf16.mxu1 %v3087_v61  ;;  %v1636_v48 = vmul.f32 %v3044_v44, %v3036_v19  ;;  %v2981_v44 = vld [vmem:[%s3862_s4 + $0x30] sm:$0xff]  }
 0xf53   :  { %v3046_v47 = vpop.eup %3045 }
 0xf54   :  { %v1637_v62 = vmul.f32 %v3046_v47, %v3038_v21  ;;  %v2982_v47 = vld [vmem:[%s3862_s4 + $0x38] sm:$0xff]  }
 0xf56   :  { %v1639_v54 = vpack.c.bf16 %v1637_v62, %v1636_v48 }
 0xf58   :  { %2760 = vmatmul.mubr.msk.bf16.vlgmr.msra.gmra.mrb[36].mxu1 %vm464_vm2, %v1639_v54 }
 0xf59   :  { %2784 = vmatpush3.bf16.msra.mxu1 %v2963_v50  ;;  %2799 = vmatprep.mubr.msk.bf16.mxu1 %vm3088_vm1, %v3087_v61 }
 0xf5a   :  { %2785 = vmatprep.subr.bf16.mxu1 %v3087_v61 }
 0xf5d   :  { %2786 = vmatpush3.bf16.msra.mxu1 %v2964_v16 }
 0xf5e   :  { %2787 = vmatprep.subr.bf16.mxu1 %v3087_v61 }
 0xf61   :  { %2788 = vmatpush3.bf16.msra.mxu1 %v2966_v18 }
 0xf62   :  { %2789 = vmatprep.subr.bf16.mxu1 %v3087_v61 }
 0xf65   :  { %2790 = vmatpush3.bf16.msra.mxu1 %v2968_v22  ;;  %v1900_v22 = vrot.slane %v3593_v56, %v3431_v49 }
 0xf66   :  { %2791 = vmatprep.subr.bf16.mxu1 %v3087_v61 }
 0xf69   :  { %2792 = vmatpush3.bf16.msra.mxu1 %v2970_v55 }
 0xf6a   :  { %2793 = vmatprep.subr.bf16.mxu1 %v3087_v61 }
 0xf6d   :  { %2794 = vmatpush3.bf16.msra.mxu1 %v2972_v31 }
 0xf6e   :  { %2795 = vmatprep.subr.bf16.mxu1 %v3087_v61 }
 0xf71   :  { %2796 = vmatpush3.bf16.msra.mxu1 %v2974_v57 }
 0xf72   :  { %2797 = vmatprep.subr.bf16.mxu1 %v3087_v61 }
 0xf75   :  { %2798 = vmatpush3.bf16.msra.mxu1 %v2976_v59 }
 0xf76   :  { %2815 = vmatprep.subr.bf16.mxu1 %v3087_v61 }
0x1023   :  { %v1565_v2 = vpop.f32.mrb[32].mxu1 }
0x1024   :  { %v2749_v3 = vpop.f32.mrb[33].mxu1 }
0x1025   :  { %v1568_v4 = vpop.f32.mrb[34].mxu1 }
0x1026   :  { %v1572_v5 = vpack.c.bf16 %v1568_v4, %v1565_v2  ;;  %v2750_v63 = vpop.f32.mrb[35].mxu1 }
0x1027   :  { %v2984_v63 = vld [vmem:[%s3863_s5 + $0x48] sm:$0xff]  }
0x1028   :  { %2800 = vmatmul.mubr.bf16.vlgmr.msra.gmra.mrb[40].mxu1 %v1572_v5  ;;  %v2983_v5 = vld [vmem:[%s3863_s5 + $0x40] sm:$0xff]  }
0x1029   :  { %2831 = vmatprep.mubr.msk.bf16.mxu1 %vm3088_vm1, %v3087_v61  ;;  %2816 = vmatpush3.bf16.msra.mxu1 %v2983_v5  ;;  %v2993_v5 = vld [vmem:[%s3864_s6 + $0x10] sm:$0xff]  }
0x102a   :  { %2817 = vmatprep.subr.bf16.mxu1 %v3087_v61 }
0x102b   :  { %v1677_v0 = vpop.f32.mrb[36].mxu1 }
0x102c   :  { %v2761_v6 = vpop.f32.mrb[37].mxu1 }
0x102d   :  { %v1680_v7 = vpop.f32.mrb[38].mxu1  ;;  %2818 = vmatpush3.bf16.msra.mxu1 %v2984_v63  ;;  %v2986_v6 = vld [vmem:[%s3863_s5 + $0x58] sm:$0xff]  }
0x102e   :  { %v1684_v43 = vpack.c.bf16 %v1680_v7, %v1677_v0  ;;  %v2762_v8 = vpop.f32.mrb[39].mxu1  ;;  %2819 = vmatprep.subr.bf16.mxu1 %v3087_v61  ;;  %v2985_v0 = vld [vmem:[%s3863_s5 + $0x50] sm:$0xff]   ;;  %v2987_v7 = vld [vmem:[%s3863_s5 + $0x60] sm:$0xff]   ;;  %v2994_v63 = vld [vmem:[%s3864_s6 + $0x18] sm:$0xff]  }
0x102f   :  { %v2989_v8 = vld [vmem:[%s3863_s5 + $0x70] sm:$0xff]  }
0x1030   :  { %2780 = vmatmul.mubr.bf16.vlgmr.msra.gmra.mrb[32].mxu0 %v1684_v43  ;;  %v2988_v43 = vld [vmem:[%s3863_s5 + $0x68] sm:$0xff]  }
0x1031   :  { %2811 = vmatprep.mubr.msk.bf16.mxu0 %vm3088_vm1, %v3087_v61  ;;  %2820 = vmatpush3.bf16.msra.mxu1 %v2985_v0 }
0x1032   :  { %2821 = vmatprep.subr.bf16.mxu1 %v3087_v61 }
0x1035   :  { %2822 = vmatpush3.bf16.msra.mxu1 %v2986_v6 }
0x1036   :  { %2823 = vmatprep.subr.bf16.mxu1 %v3087_v61 }
0x1039   :  { %2824 = vmatpush3.bf16.msra.mxu1 %v2987_v7 }
0x103a   :  { %2825 = vmatprep.subr.bf16.mxu1 %v3087_v61 }
0x103d   :  { %2826 = vmatpush3.bf16.msra.mxu1 %v2988_v43 }
0x103e   :  { %2827 = vmatprep.subr.bf16.mxu1 %v3087_v61 }
0x1041   :  { %2828 = vmatpush3.bf16.msra.mxu1 %v2989_v8 }
0x1042   :  { %2829 = vmatprep.subr.bf16.mxu1 %v3087_v61 }
0x10fb   :  { %v1856_v9 = vpop.f32.mrb[40].mxu1 }
0x10fc   :  { %v2801_v11 = vpop.f32.mrb[41].mxu1 }
0x10fd   :  { %v1859_v46 = vpop.f32.mrb[42].mxu1  ;;  %v1922_v11 = vrot.slane %v3593_v56, %v881_v10 }
0x10fe   :  { %v2802_v12 = vpop.f32.mrb[43].mxu1 }
0x1103   :  { %v1767_v14 = vpop.f32.mrb[32].mxu0 }
0x1104   :  { %v1857_v15 = vadd.f32 %v1856_v9, %v1767_v14  ;;  %v2781_v17 = vpop.f32.mrb[33].mxu0  ;;  %v2990_v9 = vld [vmem:[%s3863_s5 + $0x78] sm:$0xff]  }
0x1105   :  { %v1770_v19 = vpop.f32.mrb[34].mxu0  ;;  %2830 = vmatpush3.bf16.msra.mxu1 %v2990_v9 }
0x1106   :  { %v1867_v20 = vadd.f32 %v1866_v13, %v1857_v15  ;;  %v1860_v21 = vadd.f32 %v1859_v46, %v1770_v19  ;;  %v2782_v23 = vpop.f32.mrb[35].mxu0 }
0x1108   :  { %v1868_v24 = vadd.f32 %v1866_v13, %v1860_v21  ;;  %v1869_v25 = vadd.f32 %v1867_v20, %v3554_v41 }
0x110a   :  { %v1871_v26 = vsel %vm40_vm0, %v1869_v25, 0.0  ;;  %v1870_v27 = vadd.f32 %v1868_v24, %v3556_v42  ;;  %v2979_v42 = vld [vmem:[%s3862_s4 + $0x20] sm:$0xff]  }
0x110b   :  { %1872 = vadd.xlane.f32.xlu0 %v1871_v26  ;;  %2804 = vmatpush3.bf16.msra.mxu0 %v2979_v42 }
0x110c   :  { %v1874_v28 = vsel %vm40_vm0, %v1870_v27, 0.0  ;;  %2805 = vmatprep.subr.bf16.mxu0 %v3087_v61 }
0x110d   :  { %1875 = vadd.xlane.f32.xlu1 %v1874_v28 }
0x110f   :  { %2806 = vmatpush3.bf16.msra.mxu0 %v2980_v40 }
0x1110   :  { %2807 = vmatprep.subr.bf16.mxu0 %v3087_v61 }
0x1113   :  { %2808 = vmatpush3.bf16.msra.mxu0 %v2981_v44 }
0x1114   :  { %2809 = vmatprep.subr.bf16.mxu0 %v3087_v61 }
0x1117   :  { %2810 = vmatpush3.bf16.msra.mxu0 %v2982_v47 }
0x1118   :  { %2835 = vmatprep.subr.bf16.mxu0 %v3087_v61 }
0x1198   :  { %v1873_v30 = vpop.xlane.xlu0 %1872 }
0x1199   :  { %v1877_v45 = vmul.f32 0.015625, %v1873_v30 }
0x119a   :  { %v1876_v33 = vpop.xlane.xlu1 %1875 }
0x119b   :  { %v1879_v34 = vsub.f32 %v1869_v25, %v1877_v45  ;;  %v1878_v51 = vmul.f32 0.015625, %v1876_v33 }
0x119d   :  { %v1880_v52 = vsub.f32 %v1870_v27, %v1878_v51  ;;  %v1881_v35 = vmul.f32 %v1879_v34, %v1879_v34 }
0x119f   :  { %v1883_v37 = vsel %vm40_vm0, %v1881_v35, 0.0  ;;  %v1882_v38 = vmul.f32 %v1880_v52, %v1880_v52 }
0x11a0   :  { %1884 = vadd.xlane.f32.xlu0 %v1883_v37 }
0x11a1   :  { %v1886_v41 = vsel %vm40_vm0, %v1882_v38, 0.0 }
0x11a2   :  { %1887 = vadd.xlane.f32.xlu1 %v1886_v41  ;;  %v2030_v41 = vrot.slane %v3593_v56, %v988_v36 }
0x122d   :  { %v1885_v48 = vpop.xlane.xlu0 %1884 }
0x122e   :  { %v1889_v62 = vmul.f32 0.015625, %v1885_v48 }
0x122f   :  { %v1888_v50 = vpop.xlane.xlu1 %1887 }
0x1230   :  { %v1891_v54 = vadd.f32 1e-12, %v1889_v62  ;;  %v1890_v16 = vmul.f32 0.015625, %v1888_v50 }
0x1232   :  { %3047 = vrsqrt.f32 %v1891_v54  ;;  %v1892_v18 = vadd.f32 1e-12, %v1890_v16 }
0x1234   :  { %3049 = vrsqrt.f32 %v1892_v18 }
0x123c   :  { %v3048_v55 = vpop.eup %3047 }
0x123d   :  { %v1895_v31 = vmul.f32 %v3048_v55, %v1879_v34 }
0x123e   :  { %v3050_v57 = vpop.eup %3049 }
0x123f   :  { %v1901_v58 = vmul.f32 %v1900_v22, %v1895_v31  ;;  %v1896_v59 = vmul.f32 %v3050_v57, %v1880_v52 }
0x1241   :  { %v1902_v1 = vmul.f32 %v1900_v22, %v1896_v59  ;;  %v3748_v2 = vadd.f32 %v1906_v60, %v1901_v58 }
0x1243   :  { %v3750_v3 = vadd.f32 %v1906_v60, %v1902_v1 }
0x1245   :  { %v1918_v4 = vpack.c.bf16 %v3750_v3, %v3748_v2 }
0x1247   :  { %2812 = vmatmul.mubr.msk.bf16.vlgmr.msra.gmra.mrb[36].mxu0 %vm40_vm0, %v1918_v4  ;;  %v2992_v4 = vld [vmem:[%s3864_s6 + $0x8] sm:$0xff]  }
0x1248   :  { %2843 = vmatprep.mubr.msk.bf16.mxu0 %vm3088_vm1, %v3087_v61 }
0x131a   :  { %v1984_v46 = vpop.f32.mrb[36].mxu0 }
0x131b   :  { %v1985_v12 = vadd.f32 %v1984_v46, %v1922_v11  ;;  %v2813_v13 = vpop.f32.mrb[37].mxu0  ;;  %v2151_v46 = vrot.slane %v3593_v56, %v1109_v29  ;;  %v2995_v29 = vld [vmem:[%s3865_s7] sm:$0xff]  }
0x131c   :  { %v1987_v14 = vpop.f32.mrb[38].mxu0 }
0x131d   :  { %v1991_v15 = vmul.f32 %v1985_v12, %v1985_v12  ;;  %v1988_v17 = vadd.f32 %v1987_v14, %v1922_v11  ;;  %v2814_v19 = vpop.f32.mrb[39].mxu0 }
0x131f   :  { %v1993_v20 = vmul.f32 %v1991_v15, %v1985_v12  ;;  %v1992_v21 = vmul.f32 %v1988_v17, %v1988_v17  ;;  %v2157_v15 = vrot.slane %v3593_v56, %v1115_v32  ;;  %v2997_v32 = vld [vmem:[%s3865_s7 + $0x10] sm:$0xff]   ;;  %v2998_v56 = vld [vmem:[%s3865_s7 + $0x18] sm:$0xff]   ;;  %s3089_s7 = smov [#allocation2]  }
0x1320   :  { %s2333_s19 = sshll.u32 %s3089_s7, 4  ;;  %s2334_s19 = int_to_ptr.vmem [resolvable:$true] %s2333_s19 }
0x1321   :  { %v1995_v23 = vmul.f32 0.044715, %v1993_v20  ;;  %v1994_v24 = vmul.f32 %v1992_v21, %v1988_v17  ;;  %p3067_p1 = scmp.lt.s32.totalorder %s2334_s19, %s2334_s19 }
0x1323   :  { %v1997_v25 = vadd.f32 %v1995_v23, %v1985_v12  ;;  %v1996_v26 = vmul.f32 0.044715, %v1994_v24 }
0x1325   :  { %v1999_v27 = vmul.f32 0.7978846, %v1997_v25  ;;  %v1998_v28 = vadd.f32 %v1996_v26, %v1988_v17  ;;  %v3061_v26 = vld [vmem:[%s3867_s9] sm:$0xf]  ;;  %s3062_s9 = scalar_lea.vmem %s2334_s19, 32 }
0x1326   :  { %p3063_p0 = scmp.ne.s32.totalorder %s2334_s19, %s3062_s9  ;;  %p3068_p2 = scmp.lt.s32.totalorder %s3062_s9, %s3062_s9 }
0x1327   :  { %3051 = vtanh.f32 %v1999_v27  ;;  %v2000_v30 = vmul.f32 0.7978846, %v1998_v28  ;;  %v2177_v27 = vrot.slane %v3061_v26, %v3431_v49 }
0x1328   :  { %p3069_p3 = por %p3068_p2, %p3067_p1 }
0x1329   :  { %3053 = vtanh.f32 %v2000_v30 }
0x132a   :  { %p3070_p4 = pnand %p3069_p3, %p3063_p0 }
0x1331   :  { %v3052_v45 = vpop.eup %3051 }
0x1332   :  { %v2003_v10 = vadd.f32 1.0, %v3052_v45 }
0x1333   :  { %v3054_v33 = vpop.eup %3053 }
0x1334   :  { %v2005_v34 = vmul.f32 0.5, %v2003_v10  ;;  %v2004_v51 = vadd.f32 1.0, %v3054_v33 }
0x1336   :  { %v2006_v52 = vmul.f32 0.5, %v2004_v51  ;;  %v2007_v35 = vmul.f32 %v2005_v34, %v1985_v12 }
0x1338   :  { %v2008_v37 = vmul.f32 %v2006_v52, %v1988_v17 }
0x133a   :  { %v2026_v38 = vpack.c.bf16 %v2008_v37, %v2007_v35 }
0x133c   :  { %2832 = vmatmul.mubr.bf16.vlgmr.msra.gmra.mrb[44].mxu1 %v2026_v38 }
0x140f   :  { %v2113_v42 = vpop.f32.mrb[44].mxu1 }
0x1410   :  { %v2114_v40 = vadd.f32 %v2113_v42, %v2030_v41  ;;  %v2833_v44 = vpop.f32.mrb[45].mxu1 }
0x1411   :  { %v2116_v47 = vpop.f32.mrb[46].mxu1 }
0x1412   :  { %v2117_v48 = vadd.f32 %v2116_v47, %v2030_v41  ;;  %v2834_v62 = vpop.f32.mrb[47].mxu1  ;;  %v2120_v50 = vadd.f32 %v2114_v40, %v3748_v2 }
0x1414   :  { %v2122_v54 = vsel %vm40_vm0, %v2120_v50, 0.0  ;;  %v2121_v16 = vadd.f32 %v2117_v48, %v3750_v3  ;;  %v2991_v3 = vld [vmem:[%s3864_s6] sm:$0xff]  }
0x1415   :  { %2123 = vadd.xlane.f32.xlu1 %v2122_v54  ;;  %2836 = vmatpush3.bf16.msra.mxu0 %v2991_v3 }
0x1416   :  { %v2125_v18 = vsel %vm40_vm0, %v2121_v16, 0.0  ;;  %2837 = vmatprep.subr.bf16.mxu0 %v3087_v61 }
0x1417   :  { %2126 = vadd.xlane.f32.xlu0 %v2125_v18 }
0x1419   :  { %2838 = vmatpush3.bf16.msra.mxu0 %v2992_v4 }
0x141a   :  { %2839 = vmatprep.subr.bf16.mxu0 %v3087_v61 }
0x141d   :  { %2840 = vmatpush3.bf16.msra.mxu0 %v2993_v5 }
0x141e   :  { %2841 = vmatprep.subr.bf16.mxu0 %v3087_v61 }
0x1421   :  { %2842 = vmatpush3.bf16.msra.mxu0 %v2994_v63 }
0x1422   :  { %2847 = vmatprep.subr.bf16.mxu0 %v3087_v61 }
0x14a2   :  { %v2124_v22 = vpop.xlane.xlu1 %2123 }
0x14a3   :  { %v2128_v55 = vmul.f32 0.015625, %v2124_v22 }
0x14a4   :  { %v2127_v31 = vpop.xlane.xlu0 %2126 }
0x14a5   :  { %v2130_v36 = vsub.f32 %v2120_v50, %v2128_v55  ;;  %v2129_v57 = vmul.f32 0.015625, %v2127_v31 }
0x14a7   :  { %v2131_v58 = vsub.f32 %v2121_v16, %v2129_v57  ;;  %v2132_v59 = vmul.f32 %v2130_v36, %v2130_v36 }
0x14a9   :  { %v2134_v60 = vsel %vm40_vm0, %v2132_v59, 0.0  ;;  %v2133_v1 = vmul.f32 %v2131_v58, %v2131_v58 }
0x14aa   :  { %2135 = vadd.xlane.f32.xlu1 %v2134_v60 }
0x14ab   :  { %v2137_v2 = vsel %vm40_vm0, %v2133_v1, 0.0 }
0x14ac   :  { %2138 = vadd.xlane.f32.xlu0 %v2137_v2 }
0x1537   :  { %v2136_v0 = vpop.xlane.xlu1 %2135 }
0x1538   :  { %v2140_v6 = vmul.f32 0.015625, %v2136_v0 }
0x1539   :  { %v2139_v7 = vpop.xlane.xlu0 %2138 }
0x153a   :  { %v2142_v43 = vadd.f32 1e-12, %v2140_v6  ;;  %v2141_v8 = vmul.f32 0.015625, %v2139_v7 }
0x153c   :  { %3055 = vrsqrt.f32 %v2142_v43  ;;  %v2143_v9 = vadd.f32 1e-12, %v2141_v8 }
0x153e   :  { %3057 = vrsqrt.f32 %v2143_v9 }
0x1546   :  { %v3056_v11 = vpop.eup %3055 }
0x1547   :  { %v2146_v12 = vmul.f32 %v3056_v11, %v2130_v36 }
0x1548   :  { %v3058_v13 = vpop.eup %3057 }
0x1549   :  { %v2147_v14 = vmul.f32 %v3058_v13, %v2131_v58  ;;  %v2152_v17 = vmul.f32 %v2151_v46, %v2146_v12 }
0x154b   :  { %v2153_v19 = vmul.f32 %v2151_v46, %v2147_v14  ;;  %v2158_v21 = vadd.f32 %v2157_v15, %v2152_v17 }
0x154d   :  { %v2159_v20 = vadd.f32 %v2157_v15, %v2153_v19 }
0x154f   :  { %v2161_v23 = vrot.slane %v2159_v20, 7 }
0x1551   :  { %v2164_v24 = vsel %vm2163_vm3, %v2158_v21, %v2161_v23 }
0x1552   :  { %v2173_v25 = vpack.c.bf16 %v2164_v24, %v2164_v24 }
0x1554   :  { %2844 = vmatmul.mubr.msk.bf16.vlgmr.msra.gmra.mrb[40].mxu0 %vm40_vm0, %v2173_v25 }
0x1555   :  { %2855 = vmatprep.mubr.msk.bf16.mxu0 %vm3088_vm1, %v3087_v61  ;;  %2848 = vmatpush3.bf16.msra.mxu0 %v2995_v29 }
0x1556   :  { %2849 = vmatprep.subr.bf16.mxu0 %v3087_v61 }
0x1559   :  { %2850 = vmatpush3.bf16.msra.mxu0 %v2996_v39 }
0x155a   :  { %2851 = vmatprep.subr.bf16.mxu0 %v3087_v61 }
0x155d   :  { %2852 = vmatpush3.bf16.msra.mxu0 %v2997_v32 }
0x155e   :  { %2853 = vmatprep.subr.bf16.mxu0 %v3087_v61  ;;  %v2258_v61 = vrot.slane %v3061_v26, %v3436_v53 }
0x1561   :  { %2854 = vmatpush3.bf16.msra.mxu0 %v2998_v56 }
0x1627   :  { %v2239_v28 = vpop.f32.mrb[40].mxu0 }
0x1628   :  { %v2240_v30 = vadd.f32 %v2239_v28, %v2177_v27  ;;  %v2845_v45 = vpop.f32.mrb[41].mxu0 }
0x1629   :  { %v2242_v10 = vpop.f32.mrb[42].mxu0 }
0x162a   :  { %3059 = vtanh.f32 %v2240_v30  ;;  %v2846_v33 = vpop.f32.mrb[43].mxu0 }
0x1634   :  { %v3060_v34 = vpop.eup %3059 }
0x1635   :  { %v2254_v51 = vpack.c.bf16 %v3060_v34, %v3060_v34 }
0x1637   :  { %2856 = vmatmul.mubr.msk.bf16.vlgmr.msra.gmra.mrb[44].mxu0 %vm40_vm0, %v2254_v51 }
0x170a   :  { %v2320_v52 = vpop.f32.mrb[44].mxu0 }
0x170b   :  { %v2321_v35 = vadd.f32 %v2320_v52, %v2258_v61  ;;  %v2857_v37 = vpop.f32.mrb[45].mxu0 }
0x170c   :  { %v2323_v38 = vpop.f32.mrb[46].mxu0 }
0x170d   :  { %2326 = vst [vmem:[#allocation2] sm:$0x3] %v2321_v35  ;;  %v2858_v49 = vpop.f32.mrb[47].mxu0 }
0x170e   :  { %3073 = shalt.err (!%p3070_p4)
}
0x170f   :  { %s3074_s22 = scalar_lea.hbm %s3868_s10, 32 }
0x1710   :  { %p3075_p5 = scmp.ne.s32.totalorder %s3868_s10, %s3074_s22  ;;  %p3078_p6 = scmp.lt.u32.totalorder %s3074_s22, %s3868_s10 }
0x1712   :  { %p3080_p7 = pnand %p3078_p6, %p3075_p5 }
0x1714   :  { %3083 = shalt.err (!%p3080_p7)
}
0x1715   :  { %2336 = dma.vmem_to_hbm [thread:$0]  %s2334_s19, 32, %s3868_s10, [#allocation3]  }
0x1716   :  { %3084 = dma.done.wait [#allocation3], 32  }
0x1717   :  { %3085 = vsyncadd [#allocation3], 4294967264 }
0x1718   :  { %2340 = vsyncpa [#allocation3], 1 }

</bundles_post_ra>
